<compile_context>
chip_gen: v6e
topology: v6e:2x2x1
jax: 0.10.0
libtpu: 0.0.40
codegen_flags: <defaults>
</compile_context>

<pallas_src>
import math
import functools

import jax
import jax.numpy as jnp
from jax.experimental import pallas as pl
from jax.experimental.pallas import tpu as pltpu

_NEG_BIG = -1e30  # finite stand-in for -inf in the additive key-padding bias
# (a fully padded key row degrades to uniform attention instead of NaN;
#  PyTorch's masked_fill(-inf) + softmax would yield NaN on that edge case).


def _mha_kernel(q_ref, k_ref, v_ref, bias_ref, w_ref, b_ref, out_ref,
                kh_ref, vh_ref, *, n_head, d_k, scale):
    # ---- K/V projection: once per batch element (query-tile axis revisits b) ----
    @pl.when(pl.program_id(1) == 0)
    def _():
        xk = k_ref[0].astype(jnp.bfloat16)                            # (T2, C)
        xv = v_ref[0].astype(jnp.bfloat16)
        k = jnp.dot(xk, w_ref[1], preferred_element_type=jnp.float32) + b_ref[1]
        v = jnp.dot(xv, w_ref[2], preferred_element_type=jnp.float32) + b_ref[2]
        t2 = k.shape[0]
        # Head-major (H, T2, d_k) bf16 cache: exactly the layout the batched
        # score / context matmuls want, so the per-tile loop does no K/V work.
        kh_ref[...] = k.reshape(t2, n_head, d_k).transpose(1, 0, 2).astype(kh_ref.dtype)
        vh_ref[...] = v.reshape(t2, n_head, d_k).transpose(1, 0, 2).astype(vh_ref.dtype)

    # ---- Q projection for this query tile ----
    xq = q_ref[0].astype(jnp.bfloat16)                                # (tq, C)
    q = jnp.dot(xq, w_ref[0], preferred_element_type=jnp.float32) + b_ref[0]
    q = q * scale                                                     # fold 1/sqrt(d_k) into q
    tq = q.shape[0]
    qh = q.reshape(tq, n_head, d_k).transpose(1, 0, 2).astype(jnp.bfloat16)  # (H, tq, d_k)

    # ---- scores + masked softmax (kept in f32 on the VPU/EUP) ----
    bias = bias_ref[0]                                                # (1, T2) additive
    s = jnp.einsum('hqd,hkd->hqk', qh, kh_ref[...],
                   preferred_element_type=jnp.float32) + bias         # (H, tq, T2)
    m = jnp.max(s, axis=-1, keepdims=True)
    p = jnp.exp(s - m)
    denom = jnp.sum(p, axis=-1, keepdims=True)
    # nn.Dropout is identity at inference time.

    # ---- context; normalization deferred to the small (H, tq, d_k) tensor ----
    ctx = jnp.einsum('hqk,hkd->hqd', p.astype(jnp.bfloat16), vh_ref[...],
                     preferred_element_type=jnp.float32)              # (H, tq, d_k)
    ctx = ctx * pl.reciprocal(denom, approx=True)
    ctx = ctx.transpose(1, 0, 2).reshape(tq, n_head * d_k)            # (tq, C)

    # ---- output projection ----
    out = jnp.dot(ctx.astype(jnp.bfloat16), w_ref[3],
                  preferred_element_type=jnp.float32) + b_ref[3]
    out_ref[0] = out.astype(out_ref.dtype)


def _vmem_limit_bytes():
    try:
        cap = int(pltpu.get_tpu_info().vmem_capacity_bytes)
    except Exception:
        cap = 64 * 1024 * 1024            # assume v7x (most restrictive) if unknown
    return int(min(100 * 1024 * 1024, (cap * 3) // 4))


def _pick_q_tile(T1, T2, C, n_head, vmem_budget):
    """Largest query tile whose working set fits the VMEM budget."""
    d_k = C // n_head
    fixed = (
        2 * n_head * T2 * d_k * 2         # K/V head caches (bf16 scratch)
        + 2 * 2 * T2 * C * 4              # K/V input blocks (f32, double-buffered)
        + 4 * C * C * 2 + 4 * C * 4       # packed weights (bf16, single buffer) + biases
        + 2 * T2 * 4                      # additive mask bias (double-buffered)
    )

    def fits(tq):
        per_tile = (
            2 * tq * C * 4                # query input block (double-buffered)
            + 2 * tq * C * 4              # output block (double-buffered)
            + 3 * n_head * tq * T2 * 4    # scores / exp / softmax temporaries (f32)
            + 3 * n_head * tq * d_k * 4   # q heads / context temporaries
            + 2 * tq * C * 4              # projected q / merged context
        )
        return fixed + per_tile <= vmem_budget

    if fits(T1):
        return T1                         # whole sequence in one tile
    for t in (1024, 512, 256, 128, 64, 32, 16, 8):
        if t < T1 and fits(t):
            return t
    return 8                              # minimal sublane-aligned tile


def pack_espnet_mha_params(wq, bq, wk, bk, wv, bv, wo, bo):
    """Pack the four Linear layers ONCE at model-load time.

    Weights are expected as (C_in, C_out) = PyTorch weight.T and are stored in
    bf16 (MXU-native).  Biases stay f32 — they are VPU adds, not MXU operands.
    """
    w_all = jnp.stack([wq, wk, wv, wo], axis=0).astype(jnp.bfloat16)   # (4, C, C)
    b_all = jnp.stack([bq, bk, bv, bo], axis=0).astype(jnp.float32)    # (4, 1, C)
    return w_all, b_all


def espnet_mha_forward_btc(q_btc, k_btc, v_btc, packed_params, key_padding_mask=None,
                           *, n_head):
    """Batch-major entry point: q/k/v are (B, T, C); returns (B, T1, C)."""
    w_all, b_all = packed_params
    B, T1, C = q_btc.shape
    T2 = k_btc.shape[1]
    assert C % n_head == 0
    d_k = C // n_head

    if key_padding_mask is None:
        bias = jnp.zeros((B, 1, T2), jnp.float32)
    else:
        bias = key_padding_mask.astype(jnp.float32).reshape(B, 1, T2) * _NEG_BIG

    vmem_limit = _vmem_limit_bytes()
    tq = _pick_q_tile(T1, T2, C, n_head, (vmem_limit * 4) // 5)

    # Pad the query length to a tile multiple (padded rows are independent and
    # simply discarded below) instead of falling back to a full-T1 block.
    T1p = pl.cdiv(T1, tq) * tq
    if T1p != T1:
        q_btc = jnp.pad(q_btc, ((0, 0), (0, T1p - T1), (0, 0)))
    n_qt = T1p // tq

    kernel = functools.partial(_mha_kernel, n_head=n_head, d_k=d_k,
                               scale=1.0 / math.sqrt(d_k))

    def _run(const_pipeline_mode):
        const_kwargs = ({} if const_pipeline_mode is None
                        else {"pipeline_mode": const_pipeline_mode})
        return pl.pallas_call(
            kernel,
            out_shape=jax.ShapeDtypeStruct((B, T1p, C), q_btc.dtype),
            grid=(B, n_qt),
            in_specs=[
                pl.BlockSpec((1, tq, C), lambda b, i: (b, i, 0)),   # query tile
                pl.BlockSpec((1, T2, C), lambda b, i: (b, 0, 0)),   # key (full, per batch)
                pl.BlockSpec((1, T2, C), lambda b, i: (b, 0, 0)),   # value (full, per batch)
                pl.BlockSpec((1, 1, T2), lambda b, i: (b, 0, 0)),   # additive mask bias
                pl.BlockSpec((4, C, C), lambda b, i: (0, 0, 0), **const_kwargs),  # weights (bf16)
                pl.BlockSpec((4, 1, C), lambda b, i: (0, 0, 0), **const_kwargs),  # biases (f32)
            ],
            out_specs=pl.BlockSpec((1, tq, C), lambda b, i: (b, i, 0)),
            scratch_shapes=[
                pltpu.VMEM((n_head, T2, d_k), jnp.bfloat16),        # K head cache
                pltpu.VMEM((n_head, T2, d_k), jnp.bfloat16),        # V head cache
            ],
            compiler_params=pltpu.CompilerParams(
                # batch: megacore-parallel; query tiles: arbitrary so the
                # per-batch K/V projection cache in scratch is legal.
                dimension_semantics=("parallel", "arbitrary"),
                vmem_limit_bytes=vmem_limit),
        )(q_btc, k_btc, v_btc, bias, w_all, b_all)

    try:
        # Single-buffer the constant-index weight/bias operands: their block
        # never changes across the grid, so double-buffering is wasted VMEM.
        out_btc = _run(pl.Buffered(buffer_count=1))
    except Exception:
        # JAX build without BlockSpec.pipeline_mode support: default buffering.
        out_btc = _run(None)

    if T1p != T1:
        out_btc = out_btc[:, :T1, :]
    return out_btc


def espnet_mha_forward(query, key, value, packed_params, key_padding_mask=None, *, n_head):
    """Module-faithful (T, B, C) boundary.  Returns (out (T1, B, C), None).

    Callers that already hold batch-major activations should call
    espnet_mha_forward_btc directly and skip the two layout round-trips.
    """
    out_btc = espnet_mha_forward_btc(
        jnp.transpose(query, (1, 0, 2)),
        jnp.transpose(key, (1, 0, 2)),
        jnp.transpose(value, (1, 0, 2)),
        packed_params, key_padding_mask, n_head=n_head)
    return jnp.transpose(out_btc, (1, 0, 2)), None


def _reference_forward(query, key, value, params, key_padding_mask, n_head):
    """Pure-JAX f32 reference mirroring the PyTorch module (eval mode)."""
    wq, bq, wk, bk, wv, bv, wo, bo = params
    T1, B, C = query.shape
    T2 = key.shape[0]
    d_k = C // n_head
    q = jnp.transpose(query, (1, 0, 2)) @ wq + bq
    k = jnp.transpose(key, (1, 0, 2)) @ wk + bk
    v = jnp.transpose(value, (1, 0, 2)) @ wv + bv
    q = q.reshape(B, T1, n_head, d_k).transpose(0, 2, 1, 3)
    k = k.reshape(B, T2, n_head, d_k).transpose(0, 2, 1, 3)
    v = v.reshape(B, T2, n_head, d_k).transpose(0, 2, 1, 3)
    scores = jnp.einsum("bhqd,bhkd->bhqk", q, k) / math.sqrt(d_k)
    if key_padding_mask is not None:
        m = key_padding_mask[:, None, None, :].astype(bool)
        scores = jnp.where(m, -jnp.inf, scores)
    attn = jax.nn.softmax(scores, axis=-1)
    x = jnp.einsum("bhqk,bhkd->bhqd", attn, v)
    x = x.transpose(0, 2, 1, 3).reshape(B, T1, C)
    out = x @ wo + bo
    return jnp.transpose(out, (1, 0, 2))


if __name__ == "__main__":
    # Small, deterministic problem: T=8, B=2, C=32, n_head=4 (d_k=8).
    T, B, C = 8, 2, 32
    n_head = 4

    key0 = jax.random.PRNGKey(0)
    keys = jax.random.split(key0, 12)

    query = jax.random.normal(keys[0], (T, B, C), jnp.float32)
    kinp = jax.random.normal(keys[1], (T, B, C), jnp.float32)
    vinp = jax.random.normal(keys[2], (T, B, C), jnp.float32)

    # Deterministic synthetic weights: stored as (C_in, C_out) = PyTorch W^T.
    def mk_w(k):
        return 0.05 * jax.random.normal(k, (C, C), jnp.float32)

    def mk_b(k):
        return 0.05 * jax.random.normal(k, (1, C), jnp.float32)

    params = (mk_w(keys[3]), mk_b(keys[4]),   # q
              mk_w(keys[5]), mk_b(keys[6]),   # k
              mk_w(keys[7]), mk_b(keys[8]),   # v
              mk_w(keys[9]), mk_b(keys[10]))  # out

    # Pack once at "model-load" time (bf16 weights, f32 biases).
    packed = pack_espnet_mha_params(*params)

    # key_padding_mask: (B, T2) bool, True = padded key position.
    key_padding_mask = jnp.zeros((B, T), bool).at[1, -2:].set(True)

    out, attn_none = espnet_mha_forward(query, kinp, vinp, packed,
                                        key_padding_mask=key_padding_mask,
                                        n_head=n_head)
    out = jax.block_until_ready(out)

    ref = _reference_forward(query, kinp, vinp, params, key_padding_mask, n_head)
    assert out.shape == (T, B, C)
    assert attn_none is None
    # Tolerance covers bf16 MXU operands/weights and the approx (EUP) reciprocal.
    assert jnp.allclose(out, ref, atol=2e-2, rtol=2e-2), "mismatch vs reference"

    print("KERNEL_OK")
</pallas_src>

<mosaic_0001>
module attributes {stable_mosaic.version = 11 : i64} {
  func.func @_mha_kernel(%arg0: i32, %arg1: i32, %arg2: memref<1x8x32xf32, #tpu.memory_space<vmem>>, %arg3: memref<1x8x32xf32, #tpu.memory_space<vmem>>, %arg4: memref<1x8x32xf32, #tpu.memory_space<vmem>>, %arg5: memref<1x1x8xf32, #tpu.memory_space<vmem>>, %arg6: memref<4x32x32xbf16, #tpu.memory_space<vmem>>, %arg7: memref<4x1x32xf32, #tpu.memory_space<vmem>>, %arg8: memref<1x8x32xf32, #tpu.memory_space<vmem>>, %arg9: memref<4x8x8xbf16, #tpu.memory_space<vmem>>, %arg10: memref<4x8x8xbf16, #tpu.memory_space<vmem>>) attributes {dimension_semantics = [#tpu.dimension_semantics<parallel>, #tpu.dimension_semantics<arbitrary>], iteration_bounds = array<i64: 2, 1>, scalar_prefetch = 0 : i64, scratch_operands = 2 : i64, tpu.core_type = #tpu.core_type<tc>, window_params = [{transform_indices = @transform_0, window_bounds = array<i64: 1, 8, 32>}, {transform_indices = @transform_1, window_bounds = array<i64: 1, 8, 32>}, {transform_indices = @transform_2, window_bounds = array<i64: 1, 8, 32>}, {transform_indices = @transform_3, window_bounds = array<i64: 1, 1, 8>}, {pipeline_mode = #tpu.pipeline_mode<synchronous>, transform_indices = @transform_4, window_bounds = array<i64: 4, 32, 32>}, {pipeline_mode = #tpu.pipeline_mode<synchronous>, transform_indices = @transform_5, window_bounds = array<i64: 4, 1, 32>}, {transform_indices = @transform_6, window_bounds = array<i64: 1, 8, 32>}]} {
    %c0_i32 = arith.constant 0 : i32
    %0 = arith.cmpi eq, %arg1, %c0_i32 : i32
    %1 = arith.extui %0 : i1 to i32
    %c0_i32_0 = arith.constant 0 : i32
    %2 = arith.cmpi ne, %1, %c0_i32_0 : i32
    scf.if %2 {
      %c0_32 = arith.constant 0 : index
      %c0_33 = arith.constant 0 : index
      %c0_34 = arith.constant 0 : index
      %51 = vector.load %arg3[%c0_32, %c0_33, %c0_34] : memref<1x8x32xf32, #tpu.memory_space<vmem>>, vector<1x8x32xf32>
      %52 = vector.shape_cast %51 : vector<1x8x32xf32> to vector<8x32xf32>
      %53 = arith.truncf %52 : vector<8x32xf32> to vector<8x32xbf16>
      %c0_35 = arith.constant 0 : index
      %c0_36 = arith.constant 0 : index
      %c0_37 = arith.constant 0 : index
      %54 = vector.load %arg4[%c0_35, %c0_36, %c0_37] : memref<1x8x32xf32, #tpu.memory_space<vmem>>, vector<1x8x32xf32>
      %55 = vector.shape_cast %54 : vector<1x8x32xf32> to vector<8x32xf32>
      %56 = arith.truncf %55 : vector<8x32xf32> to vector<8x32xbf16>
      %c1 = arith.constant 1 : index
      %c0_38 = arith.constant 0 : index
      %c0_39 = arith.constant 0 : index
      %57 = vector.load %arg6[%c1, %c0_38, %c0_39] : memref<4x32x32xbf16, #tpu.memory_space<vmem>>, vector<1x32x32xbf16>
      %58 = vector.shape_cast %57 : vector<1x32x32xbf16> to vector<32x32xbf16>
      %cst_40 = arith.constant dense<0.000000e+00> : vector<8x32xf32>
      %59 = tpu.matmul %53, %58, %cst_40 {dimension_numbers = #tpu.dot_dimension_numbers<[1], [0], [0], [1], [0, 0, 1, 1], [], []>} : vector<8x32xbf16>, vector<32x32xbf16>, vector<8x32xf32> -> vector<8x32xf32>
      %c1_41 = arith.constant 1 : index
      %c0_42 = arith.constant 0 : index
      %c0_43 = arith.constant 0 : index
      %60 = vector.load %arg7[%c1_41, %c0_42, %c0_43] : memref<4x1x32xf32, #tpu.memory_space<vmem>>, vector<1x1x32xf32>
      %61 = vector.shape_cast %60 : vector<1x1x32xf32> to vector<1x32xf32>
      %62 = vector.broadcast %61 : vector<1x32xf32> to vector<8x32xf32>
      %63 = arith.addf %59, %62 : vector<8x32xf32>
      %c2 = arith.constant 2 : index
      %c0_44 = arith.constant 0 : index
      %c0_45 = arith.constant 0 : index
      %64 = vector.load %arg6[%c2, %c0_44, %c0_45] : memref<4x32x32xbf16, #tpu.memory_space<vmem>>, vector<1x32x32xbf16>
      %65 = vector.shape_cast %64 : vector<1x32x32xbf16> to vector<32x32xbf16>
      %cst_46 = arith.constant dense<0.000000e+00> : vector<8x32xf32>
      %66 = tpu.matmul %56, %65, %cst_46 {dimension_numbers = #tpu.dot_dimension_numbers<[1], [0], [0], [1], [0, 0, 1, 1], [], []>} : vector<8x32xbf16>, vector<32x32xbf16>, vector<8x32xf32> -> vector<8x32xf32>
      %c2_47 = arith.constant 2 : index
      %c0_48 = arith.constant 0 : index
      %c0_49 = arith.constant 0 : index
      %67 = vector.load %arg7[%c2_47, %c0_48, %c0_49] : memref<4x1x32xf32, #tpu.memory_space<vmem>>, vector<1x1x32xf32>
      %68 = vector.shape_cast %67 : vector<1x1x32xf32> to vector<1x32xf32>
      %69 = vector.broadcast %68 : vector<1x32xf32> to vector<8x32xf32>
      %70 = arith.addf %66, %69 : vector<8x32xf32>
      %71 = vector.shape_cast %63 : vector<8x32xf32> to vector<8x4x8xf32>
      %72 = tpu.transpose %71, [1, 0, 2] : vector<8x4x8xf32> -> vector<4x8x8xf32>
      %73 = arith.truncf %72 : vector<4x8x8xf32> to vector<4x8x8xbf16>
      %c0_50 = arith.constant 0 : index
      %c0_51 = arith.constant 0 : index
      %c0_52 = arith.constant 0 : index
      %74 = vector.load %arg9[%c0_50, %c0_51, %c0_52] : memref<4x8x8xbf16, #tpu.memory_space<vmem>>, vector<4x8x8xbf16>
      tpu.vector_store %arg9[%c0_50, %c0_51, %c0_52], %73 {strides = array<i32>} : memref<4x8x8xbf16, #tpu.memory_space<vmem>>, vector<4x8x8xbf16>,
      %75 = vector.shape_cast %70 : vector<8x32xf32> to vector<8x4x8xf32>
      %76 = tpu.transpose %75, [1, 0, 2] : vector<8x4x8xf32> -> vector<4x8x8xf32>
      %77 = arith.truncf %76 : vector<4x8x8xf32> to vector<4x8x8xbf16>
      %c0_53 = arith.constant 0 : index
      %c0_54 = arith.constant 0 : index
      %c0_55 = arith.constant 0 : index
      %78 = vector.load %arg10[%c0_53, %c0_54, %c0_55] : memref<4x8x8xbf16, #tpu.memory_space<vmem>>, vector<4x8x8xbf16>
      tpu.vector_store %arg10[%c0_53, %c0_54, %c0_55], %77 {strides = array<i32>} : memref<4x8x8xbf16, #tpu.memory_space<vmem>>, vector<4x8x8xbf16>,
    } else {
    }
    %c0 = arith.constant 0 : index
    %c0_1 = arith.constant 0 : index
    %c0_2 = arith.constant 0 : index
    %3 = vector.load %arg2[%c0, %c0_1, %c0_2] : memref<1x8x32xf32, #tpu.memory_space<vmem>>, vector<1x8x32xf32>
    %4 = vector.shape_cast %3 : vector<1x8x32xf32> to vector<8x32xf32>
    %5 = arith.truncf %4 : vector<8x32xf32> to vector<8x32xbf16>
    %c0_3 = arith.constant 0 : index
    %c0_4 = arith.constant 0 : index
    %c0_5 = arith.constant 0 : index
    %6 = vector.load %arg6[%c0_3, %c0_4, %c0_5] : memref<4x32x32xbf16, #tpu.memory_space<vmem>>, vector<1x32x32xbf16>
    %7 = vector.shape_cast %6 : vector<1x32x32xbf16> to vector<32x32xbf16>
    %cst = arith.constant dense<0.000000e+00> : vector<8x32xf32>
    %8 = tpu.matmul %5, %7, %cst {dimension_numbers = #tpu.dot_dimension_numbers<[1], [0], [0], [1], [0, 0, 1, 1], [], []>} : vector<8x32xbf16>, vector<32x32xbf16>, vector<8x32xf32> -> vector<8x32xf32>
    %c0_6 = arith.constant 0 : index
    %c0_7 = arith.constant 0 : index
    %c0_8 = arith.constant 0 : index
    %9 = vector.load %arg7[%c0_6, %c0_7, %c0_8] : memref<4x1x32xf32, #tpu.memory_space<vmem>>, vector<1x1x32xf32>
    %10 = vector.shape_cast %9 : vector<1x1x32xf32> to vector<1x32xf32>
    %11 = vector.broadcast %10 : vector<1x32xf32> to vector<8x32xf32>
    %12 = arith.addf %8, %11 : vector<8x32xf32>
    %cst_9 = arith.constant 0.353553385 : f32
    %13 = vector.broadcast %cst_9 : f32 to vector<8x32xf32>
    %14 = arith.mulf %12, %13 : vector<8x32xf32>
    %15 = vector.shape_cast %14 : vector<8x32xf32> to vector<8x4x8xf32>
    %16 = tpu.transpose %15, [1, 0, 2] : vector<8x4x8xf32> -> vector<4x8x8xf32>
    %17 = arith.truncf %16 : vector<4x8x8xf32> to vector<4x8x8xbf16>
    %c0_10 = arith.constant 0 : index
    %c0_11 = arith.constant 0 : index
    %c0_12 = arith.constant 0 : index
    %18 = vector.load %arg5[%c0_10, %c0_11, %c0_12] : memref<1x1x8xf32, #tpu.memory_space<vmem>>, vector<1x1x8xf32>
    %19 = vector.shape_cast %18 : vector<1x1x8xf32> to vector<1x8xf32>
    %c0_13 = arith.constant 0 : index
    %c0_14 = arith.constant 0 : index
    %c0_15 = arith.constant 0 : index
    %20 = vector.load %arg9[%c0_13, %c0_14, %c0_15] : memref<4x8x8xbf16, #tpu.memory_space<vmem>>, vector<4x8x8xbf16>
    "tpu.trace_start"() <{level = 10 : i32, message = "hqd,hkd->hqk"}> : () -> ()
    %cst_16 = arith.constant dense<0.000000e+00> : vector<4x8x8xf32>
    %21 = tpu.matmul %17, %20, %cst_16 {dimension_numbers = #tpu.dot_dimension_numbers<[2], [2], [1], [1], [0, 0, 0, 1, 1, 1], [0], [0]>} : vector<4x8x8xbf16>, vector<4x8x8xbf16>, vector<4x8x8xf32> -> vector<4x8x8xf32>
    "tpu.trace_stop"() : () -> ()
    %22 = vector.shape_cast %19 : vector<1x8xf32> to vector<1x1x8xf32>
    %23 = vector.broadcast %22 : vector<1x1x8xf32> to vector<4x8x8xf32>
    %24 = arith.addf %21, %23 : vector<4x8x8xf32>
    %cst_17 = arith.constant dense<0xFF800000> : vector<4x8xf32>
    %25 = vector.multi_reduction <maximumf>, %24, %cst_17 [2] : vector<4x8x8xf32> to vector<4x8xf32>
    %26 = vector.shape_cast %25 : vector<4x8xf32> to vector<4x8x1xf32>
    %27 = vector.broadcast %26 : vector<4x8x1xf32> to vector<4x8x8xf32>
    %28 = arith.subf %24, %27 : vector<4x8x8xf32>
    %29 = math.exp %28 : vector<4x8x8xf32>
    %cst_18 = arith.constant dense<0.000000e+00> : vector<4x8xf32>
    %30 = vector.multi_reduction <add>, %29, %cst_18 [2] : vector<4x8x8xf32> to vector<4x8xf32>
    %31 = vector.shape_cast %30 : vector<4x8xf32> to vector<4x8x1xf32>
    %32 = arith.truncf %29 : vector<4x8x8xf32> to vector<4x8x8xbf16>
    %c0_19 = arith.constant 0 : index
    %c0_20 = arith.constant 0 : index
    %c0_21 = arith.constant 0 : index
    %33 = vector.load %arg10[%c0_19, %c0_20, %c0_21] : memref<4x8x8xbf16, #tpu.memory_space<vmem>>, vector<4x8x8xbf16>
    "tpu.trace_start"() <{level = 10 : i32, message = "hqk,hkd->hqd"}> : () -> ()
    %cst_22 = arith.constant dense<0.000000e+00> : vector<4x8x8xf32>
    %34 = tpu.matmul %32, %33, %cst_22 {dimension_numbers = #tpu.dot_dimension_numbers<[2], [1], [1], [2], [0, 0, 0, 1, 1, 2], [0], [0]>} : vector<4x8x8xbf16>, vector<4x8x8xbf16>, vector<4x8x8xf32> -> vector<4x8x8xf32>
    "tpu.trace_stop"() : () -> ()
    %35 = tpu.reciprocal %31 {approx = true} : vector<4x8x1xf32> -> vector<4x8x1xf32>
    %36 = vector.broadcast %35 : vector<4x8x1xf32> to vector<4x8x8xf32>
    %37 = arith.mulf %34, %36 : vector<4x8x8xf32>
    %38 = tpu.transpose %37, [1, 0, 2] : vector<4x8x8xf32> -> vector<8x4x8xf32>
    %39 = vector.shape_cast %38 : vector<8x4x8xf32> to vector<8x32xf32>
    %40 = arith.truncf %39 : vector<8x32xf32> to vector<8x32xbf16>
    %c3 = arith.constant 3 : index
    %c0_23 = arith.constant 0 : index
    %c0_24 = arith.constant 0 : index
    %41 = vector.load %arg6[%c3, %c0_23, %c0_24] : memref<4x32x32xbf16, #tpu.memory_space<vmem>>, vector<1x32x32xbf16>
    %42 = vector.shape_cast %41 : vector<1x32x32xbf16> to vector<32x32xbf16>
    %cst_25 = arith.constant dense<0.000000e+00> : vector<8x32xf32>
    %43 = tpu.matmul %40, %42, %cst_25 {dimension_numbers = #tpu.dot_dimension_numbers<[1], [0], [0], [1], [0, 0, 1, 1], [], []>} : vector<8x32xbf16>, vector<32x32xbf16>, vector<8x32xf32> -> vector<8x32xf32>
    %c3_26 = arith.constant 3 : index
    %c0_27 = arith.constant 0 : index
    %c0_28 = arith.constant 0 : index
    %44 = vector.load %arg7[%c3_26, %c0_27, %c0_28] : memref<4x1x32xf32, #tpu.memory_space<vmem>>, vector<1x1x32xf32>
    %45 = vector.shape_cast %44 : vector<1x1x32xf32> to vector<1x32xf32>
    %46 = vector.broadcast %45 : vector<1x32xf32> to vector<8x32xf32>
    %47 = arith.addf %43, %46 : vector<8x32xf32>
    %c0_29 = arith.constant 0 : index
    %c0_30 = arith.constant 0 : index
    %c0_31 = arith.constant 0 : index
    %48 = vector.load %arg8[%c0_29, %c0_30, %c0_31] : memref<1x8x32xf32, #tpu.memory_space<vmem>>, vector<1x8x32xf32>
    %49 = vector.shape_cast %48 : vector<1x8x32xf32> to vector<8x32xf32>
    %50 = vector.shape_cast %47 : vector<8x32xf32> to vector<1x8x32xf32>
    tpu.vector_store %arg8[%c0_29, %c0_30, %c0_31], %50 {strides = array<i32>} : memref<1x8x32xf32, #tpu.memory_space<vmem>>, vector<1x8x32xf32>,
    return
  }
  func.func @transform_0(%arg0: i32, %arg1: i32) -> (i32, i32, i32) {
    %c0_i32 = arith.constant 0 : i32
    %c0_i32_0 = arith.constant 0 : i32
    return %arg0, %arg1, %c0_i32 : i32, i32, i32
  }
  func.func @transform_1(%arg0: i32, %arg1: i32) -> (i32, i32, i32) {
    %c0_i32 = arith.constant 0 : i32
    %c0_i32_0 = arith.constant 0 : i32
    %c0_i32_1 = arith.constant 0 : i32
    return %arg0, %c0_i32, %c0_i32_0 : i32, i32, i32
  }
  func.func @transform_2(%arg0: i32, %arg1: i32) -> (i32, i32, i32) {
    %c0_i32 = arith.constant 0 : i32
    %c0_i32_0 = arith.constant 0 : i32
    %c0_i32_1 = arith.constant 0 : i32
    return %arg0, %c0_i32, %c0_i32_0 : i32, i32, i32
  }
  func.func @transform_3(%arg0: i32, %arg1: i32) -> (i32, i32, i32) {
    %c0_i32 = arith.constant 0 : i32
    %c0_i32_0 = arith.constant 0 : i32
    %c0_i32_1 = arith.constant 0 : i32
    return %arg0, %c0_i32, %c0_i32_0 : i32, i32, i32
  }
  func.func @transform_4(%arg0: i32, %arg1: i32) -> (i32, i32, i32) {
    %c0_i32 = arith.constant 0 : i32
    %c0_i32_0 = arith.constant 0 : i32
    %c0_i32_1 = arith.constant 0 : i32
    %c0_i32_2 = arith.constant 0 : i32
    return %c0_i32, %c0_i32_0, %c0_i32_1 : i32, i32, i32
  }
  func.func @transform_5(%arg0: i32, %arg1: i32) -> (i32, i32, i32) {
    %c0_i32 = arith.constant 0 : i32
    %c0_i32_0 = arith.constant 0 : i32
    %c0_i32_1 = arith.constant 0 : i32
    %c0_i32_2 = arith.constant 0 : i32
    return %c0_i32, %c0_i32_0, %c0_i32_1 : i32, i32, i32
  }
  func.func @transform_6(%arg0: i32, %arg1: i32) -> (i32, i32, i32) {
    %c0_i32 = arith.constant 0 : i32
    %c0_i32_0 = arith.constant 0 : i32
    return %arg0, %arg1, %c0_i32 : i32, i32, i32
  }
}

module attributes {stable_mosaic.version = 11 : i64} {
  func.func @_mha_kernel(%arg0: i32, %arg1: i32, %arg2: memref<1x8x32xf32, #tpu.memory_space<vmem>>, %arg3: memref<1x8x32xf32, #tpu.memory_space<vmem>>, %arg4: memref<1x8x32xf32, #tpu.memory_space<vmem>>, %arg5: memref<1x1x8xf32, #tpu.memory_space<vmem>>, %arg6: memref<4x32x32xbf16, #tpu.memory_space<vmem>>, %arg7: memref<4x1x32xf32, #tpu.memory_space<vmem>>, %arg8: memref<1x8x32xf32, #tpu.memory_space<vmem>>, %arg9: memref<4x8x8xbf16, #tpu.memory_space<vmem>>, %arg10: memref<4x8x8xbf16, #tpu.memory_space<vmem>>) attributes {dimension_semantics = [#tpu.dimension_semantics<parallel>, #tpu.dimension_semantics<arbitrary>], iteration_bounds = array<i64: 2, 1>, scalar_prefetch = 0 : i64, scratch_operands = 2 : i64, tpu.core_type = #tpu.core_type<tc>, window_params = [{transform_indices = @transform_0, window_bounds = array<i64: 1, 8, 32>}, {transform_indices = @transform_1, window_bounds = array<i64: 1, 8, 32>}, {transform_indices = @transform_2, window_bounds = array<i64: 1, 8, 32>}, {transform_indices = @transform_3, window_bounds = array<i64: 1, 1, 8>}, {pipeline_mode = #tpu.pipeline_mode<synchronous>, transform_indices = @transform_4, window_bounds = array<i64: 4, 32, 32>}, {pipeline_mode = #tpu.pipeline_mode<synchronous>, transform_indices = @transform_5, window_bounds = array<i64: 4, 1, 32>}, {transform_indices = @transform_6, window_bounds = array<i64: 1, 8, 32>}]} {
    %c0_i32 = arith.constant 0 : i32
    %0 = arith.cmpi eq, %arg1, %c0_i32 : i32
    %1 = arith.extui %0 : i1 to i32
    %c0_i32_0 = arith.constant 0 : i32
    %2 = arith.cmpi ne, %1, %c0_i32_0 : i32
    scf.if %2 {
      %c0_32 = arith.constant 0 : index
      %c0_33 = arith.constant 0 : index
      %c0_34 = arith.constant 0 : index
      %51 = vector.load %arg3[%c0_32, %c0_33, %c0_34] : memref<1x8x32xf32, #tpu.memory_space<vmem>>, vector<1x8x32xf32>
      %52 = vector.shape_cast %51 : vector<1x8x32xf32> to vector<8x32xf32>
      %53 = arith.truncf %52 : vector<8x32xf32> to vector<8x32xbf16>
      %c0_35 = arith.constant 0 : index
      %c0_36 = arith.constant 0 : index
      %c0_37 = arith.constant 0 : index
      %54 = vector.load %arg4[%c0_35, %c0_36, %c0_37] : memref<1x8x32xf32, #tpu.memory_space<vmem>>, vector<1x8x32xf32>
      %55 = vector.shape_cast %54 : vector<1x8x32xf32> to vector<8x32xf32>
      %56 = arith.truncf %55 : vector<8x32xf32> to vector<8x32xbf16>
      %c1 = arith.constant 1 : index
      %c0_38 = arith.constant 0 : index
      %c0_39 = arith.constant 0 : index
      %57 = vector.load %arg6[%c1, %c0_38, %c0_39] : memref<4x32x32xbf16, #tpu.memory_space<vmem>>, vector<1x32x32xbf16>
      %58 = vector.shape_cast %57 : vector<1x32x32xbf16> to vector<32x32xbf16>
      %cst_40 = arith.constant dense<0.000000e+00> : vector<8x32xf32>
      %59 = tpu.matmul %53, %58, %cst_40 {dimension_numbers = #tpu.dot_dimension_numbers<[1], [0], [0], [1], [0, 0, 1, 1], [], []>} : vector<8x32xbf16>, vector<32x32xbf16>, vector<8x32xf32> -> vector<8x32xf32>
      %c1_41 = arith.constant 1 : index
      %c0_42 = arith.constant 0 : index
      %c0_43 = arith.constant 0 : index
      %60 = vector.load %arg7[%c1_41, %c0_42, %c0_43] : memref<4x1x32xf32, #tpu.memory_space<vmem>>, vector<1x1x32xf32>
      %61 = vector.shape_cast %60 : vector<1x1x32xf32> to vector<1x32xf32>
      %62 = vector.broadcast %61 : vector<1x32xf32> to vector<8x32xf32>
      %63 = arith.addf %59, %62 : vector<8x32xf32>
      %c2 = arith.constant 2 : index
      %c0_44 = arith.constant 0 : index
      %c0_45 = arith.constant 0 : index
      %64 = vector.load %arg6[%c2, %c0_44, %c0_45] : memref<4x32x32xbf16, #tpu.memory_space<vmem>>, vector<1x32x32xbf16>
      %65 = vector.shape_cast %64 : vector<1x32x32xbf16> to vector<32x32xbf16>
      %cst_46 = arith.constant dense<0.000000e+00> : vector<8x32xf32>
      %66 = tpu.matmul %56, %65, %cst_46 {dimension_numbers = #tpu.dot_dimension_numbers<[1], [0], [0], [1], [0, 0, 1, 1], [], []>} : vector<8x32xbf16>, vector<32x32xbf16>, vector<8x32xf32> -> vector<8x32xf32>
      %c2_47 = arith.constant 2 : index
      %c0_48 = arith.constant 0 : index
      %c0_49 = arith.constant 0 : index
      %67 = vector.load %arg7[%c2_47, %c0_48, %c0_49] : memref<4x1x32xf32, #tpu.memory_space<vmem>>, vector<1x1x32xf32>
      %68 = vector.shape_cast %67 : vector<1x1x32xf32> to vector<1x32xf32>
      %69 = vector.broadcast %68 : vector<1x32xf32> to vector<8x32xf32>
      %70 = arith.addf %66, %69 : vector<8x32xf32>
      %71 = vector.shape_cast %63 : vector<8x32xf32> to vector<8x4x8xf32>
      %72 = tpu.transpose %71, [1, 0, 2] : vector<8x4x8xf32> -> vector<4x8x8xf32>
      %73 = arith.truncf %72 : vector<4x8x8xf32> to vector<4x8x8xbf16>
      %c0_50 = arith.constant 0 : index
      %c0_51 = arith.constant 0 : index
      %c0_52 = arith.constant 0 : index
      %74 = vector.load %arg9[%c0_50, %c0_51, %c0_52] : memref<4x8x8xbf16, #tpu.memory_space<vmem>>, vector<4x8x8xbf16>
      tpu.vector_store %arg9[%c0_50, %c0_51, %c0_52], %73 {strides = array<i32>} : memref<4x8x8xbf16, #tpu.memory_space<vmem>>, vector<4x8x8xbf16>,
      %75 = vector.shape_cast %70 : vector<8x32xf32> to vector<8x4x8xf32>
      %76 = tpu.transpose %75, [1, 0, 2] : vector<8x4x8xf32> -> vector<4x8x8xf32>
      %77 = arith.truncf %76 : vector<4x8x8xf32> to vector<4x8x8xbf16>
      %c0_53 = arith.constant 0 : index
      %c0_54 = arith.constant 0 : index
      %c0_55 = arith.constant 0 : index
      %78 = vector.load %arg10[%c0_53, %c0_54, %c0_55] : memref<4x8x8xbf16, #tpu.memory_space<vmem>>, vector<4x8x8xbf16>
      tpu.vector_store %arg10[%c0_53, %c0_54, %c0_55], %77 {strides = array<i32>} : memref<4x8x8xbf16, #tpu.memory_space<vmem>>, vector<4x8x8xbf16>,
    } else {
    }
    %c0 = arith.constant 0 : index
    %c0_1 = arith.constant 0 : index
    %c0_2 = arith.constant 0 : index
    %3 = vector.load %arg2[%c0, %c0_1, %c0_2] : memref<1x8x32xf32, #tpu.memory_space<vmem>>, vector<1x8x32xf32>
    %4 = vector.shape_cast %3 : vector<1x8x32xf32> to vector<8x32xf32>
    %5 = arith.truncf %4 : vector<8x32xf32> to vector<8x32xbf16>
    %c0_3 = arith.constant 0 : index
    %c0_4 = arith.constant 0 : index
    %c0_5 = arith.constant 0 : index
    %6 = vector.load %arg6[%c0_3, %c0_4, %c0_5] : memref<4x32x32xbf16, #tpu.memory_space<vmem>>, vector<1x32x32xbf16>
    %7 = vector.shape_cast %6 : vector<1x32x32xbf16> to vector<32x32xbf16>
    %cst = arith.constant dense<0.000000e+00> : vector<8x32xf32>
    %8 = tpu.matmul %5, %7, %cst {dimension_numbers = #tpu.dot_dimension_numbers<[1], [0], [0], [1], [0, 0, 1, 1], [], []>} : vector<8x32xbf16>, vector<32x32xbf16>, vector<8x32xf32> -> vector<8x32xf32>
    %c0_6 = arith.constant 0 : index
    %c0_7 = arith.constant 0 : index
    %c0_8 = arith.constant 0 : index
    %9 = vector.load %arg7[%c0_6, %c0_7, %c0_8] : memref<4x1x32xf32, #tpu.memory_space<vmem>>, vector<1x1x32xf32>
    %10 = vector.shape_cast %9 : vector<1x1x32xf32> to vector<1x32xf32>
    %11 = vector.broadcast %10 : vector<1x32xf32> to vector<8x32xf32>
    %12 = arith.addf %8, %11 : vector<8x32xf32>
    %cst_9 = arith.constant 0.353553385 : f32
    %13 = vector.broadcast %cst_9 : f32 to vector<8x32xf32>
    %14 = arith.mulf %12, %13 : vector<8x32xf32>
    %15 = vector.shape_cast %14 : vector<8x32xf32> to vector<8x4x8xf32>
    %16 = tpu.transpose %15, [1, 0, 2] : vector<8x4x8xf32> -> vector<4x8x8xf32>
    %17 = arith.truncf %16 : vector<4x8x8xf32> to vector<4x8x8xbf16>
    %c0_10 = arith.constant 0 : index
    %c0_11 = arith.constant 0 : index
    %c0_12 = arith.constant 0 : index
    %18 = vector.load %arg5[%c0_10, %c0_11, %c0_12] : memref<1x1x8xf32, #tpu.memory_space<vmem>>, vector<1x1x8xf32>
    %19 = vector.shape_cast %18 : vector<1x1x8xf32> to vector<1x8xf32>
    %c0_13 = arith.constant 0 : index
    %c0_14 = arith.constant 0 : index
    %c0_15 = arith.constant 0 : index
    %20 = vector.load %arg9[%c0_13, %c0_14, %c0_15] : memref<4x8x8xbf16, #tpu.memory_space<vmem>>, vector<4x8x8xbf16>
    "tpu.trace_start"() <{level = 10 : i32, message = "hqd,hkd->hqk"}> : () -> ()
    %cst_16 = arith.constant dense<0.000000e+00> : vector<4x8x8xf32>
    %21 = tpu.matmul %17, %20, %cst_16 {dimension_numbers = #tpu.dot_dimension_numbers<[2], [2], [1], [1], [0, 0, 0, 1, 1, 1], [0], [0]>} : vector<4x8x8xbf16>, vector<4x8x8xbf16>, vector<4x8x8xf32> -> vector<4x8x8xf32>
    "tpu.trace_stop"() : () -> ()
    %22 = vector.shape_cast %19 : vector<1x8xf32> to vector<1x1x8xf32>
    %23 = vector.broadcast %22 : vector<1x1x8xf32> to vector<4x8x8xf32>
    %24 = arith.addf %21, %23 : vector<4x8x8xf32>
    %cst_17 = arith.constant dense<0xFF800000> : vector<4x8xf32>
    %25 = vector.multi_reduction <maximumf>, %24, %cst_17 [2] : vector<4x8x8xf32> to vector<4x8xf32>
    %26 = vector.shape_cast %25 : vector<4x8xf32> to vector<4x8x1xf32>
    %27 = vector.broadcast %26 : vector<4x8x1xf32> to vector<4x8x8xf32>
    %28 = arith.subf %24, %27 : vector<4x8x8xf32>
    %29 = math.exp %28 : vector<4x8x8xf32>
    %cst_18 = arith.constant dense<0.000000e+00> : vector<4x8xf32>
    %30 = vector.multi_reduction <add>, %29, %cst_18 [2] : vector<4x8x8xf32> to vector<4x8xf32>
    %31 = vector.shape_cast %30 : vector<4x8xf32> to vector<4x8x1xf32>
    %32 = arith.truncf %29 : vector<4x8x8xf32> to vector<4x8x8xbf16>
    %c0_19 = arith.constant 0 : index
    %c0_20 = arith.constant 0 : index
    %c0_21 = arith.constant 0 : index
    %33 = vector.load %arg10[%c0_19, %c0_20, %c0_21] : memref<4x8x8xbf16, #tpu.memory_space<vmem>>, vector<4x8x8xbf16>
    "tpu.trace_start"() <{level = 10 : i32, message = "hqk,hkd->hqd"}> : () -> ()
    %cst_22 = arith.constant dense<0.000000e+00> : vector<4x8x8xf32>
    %34 = tpu.matmul %32, %33, %cst_22 {dimension_numbers = #tpu.dot_dimension_numbers<[2], [1], [1], [2], [0, 0, 0, 1, 1, 2], [0], [0]>} : vector<4x8x8xbf16>, vector<4x8x8xbf16>, vector<4x8x8xf32> -> vector<4x8x8xf32>
    "tpu.trace_stop"() : () -> ()
    %35 = tpu.reciprocal %31 {approx = true} : vector<4x8x1xf32> -> vector<4x8x1xf32>
    %36 = vector.broadcast %35 : vector<4x8x1xf32> to vector<4x8x8xf32>
    %37 = arith.mulf %34, %36 : vector<4x8x8xf32>
    %38 = tpu.transpose %37, [1, 0, 2] : vector<4x8x8xf32> -> vector<8x4x8xf32>
    %39 = vector.shape_cast %38 : vector<8x4x8xf32> to vector<8x32xf32>
    %40 = arith.truncf %39 : vector<8x32xf32> to vector<8x32xbf16>
    %c3 = arith.constant 3 : index
    %c0_23 = arith.constant 0 : index
    %c0_24 = arith.constant 0 : index
    %41 = vector.load %arg6[%c3, %c0_23, %c0_24] : memref<4x32x32xbf16, #tpu.memory_space<vmem>>, vector<1x32x32xbf16>
    %42 = vector.shape_cast %41 : vector<1x32x32xbf16> to vector<32x32xbf16>
    %cst_25 = arith.constant dense<0.000000e+00> : vector<8x32xf32>
    %43 = tpu.matmul %40, %42, %cst_25 {dimension_numbers = #tpu.dot_dimension_numbers<[1], [0], [0], [1], [0, 0, 1, 1], [], []>} : vector<8x32xbf16>, vector<32x32xbf16>, vector<8x32xf32> -> vector<8x32xf32>
    %c3_26 = arith.constant 3 : index
    %c0_27 = arith.constant 0 : index
    %c0_28 = arith.constant 0 : index
    %44 = vector.load %arg7[%c3_26, %c0_27, %c0_28] : memref<4x1x32xf32, #tpu.memory_space<vmem>>, vector<1x1x32xf32>
    %45 = vector.shape_cast %44 : vector<1x1x32xf32> to vector<1x32xf32>
    %46 = vector.broadcast %45 : vector<1x32xf32> to vector<8x32xf32>
    %47 = arith.addf %43, %46 : vector<8x32xf32>
    %c0_29 = arith.constant 0 : index
    %c0_30 = arith.constant 0 : index
    %c0_31 = arith.constant 0 : index
    %48 = vector.load %arg8[%c0_29, %c0_30, %c0_31] : memref<1x8x32xf32, #tpu.memory_space<vmem>>, vector<1x8x32xf32>
    %49 = vector.shape_cast %48 : vector<1x8x32xf32> to vector<8x32xf32>
    %50 = vector.shape_cast %47 : vector<8x32xf32> to vector<1x8x32xf32>
    tpu.vector_store %arg8[%c0_29, %c0_30, %c0_31], %50 {strides = array<i32>} : memref<1x8x32xf32, #tpu.memory_space<vmem>>, vector<1x8x32xf32>,
    return
  }
  func.func @transform_0(%arg0: i32, %arg1: i32) -> (i32, i32, i32) {
    %c0_i32 = arith.constant 0 : i32
    %c0_i32_0 = arith.constant 0 : i32
    return %arg0, %arg1, %c0_i32 : i32, i32, i32
  }
  func.func @transform_1(%arg0: i32, %arg1: i32) -> (i32, i32, i32) {
    %c0_i32 = arith.constant 0 : i32
    %c0_i32_0 = arith.constant 0 : i32
    %c0_i32_1 = arith.constant 0 : i32
    return %arg0, %c0_i32, %c0_i32_0 : i32, i32, i32
  }
  func.func @transform_2(%arg0: i32, %arg1: i32) -> (i32, i32, i32) {
    %c0_i32 = arith.constant 0 : i32
    %c0_i32_0 = arith.constant 0 : i32
    %c0_i32_1 = arith.constant 0 : i32
    return %arg0, %c0_i32, %c0_i32_0 : i32, i32, i32
  }
  func.func @transform_3(%arg0: i32, %arg1: i32) -> (i32, i32, i32) {
    %c0_i32 = arith.constant 0 : i32
    %c0_i32_0 = arith.constant 0 : i32
    %c0_i32_1 = arith.constant 0 : i32
    return %arg0, %c0_i32, %c0_i32_0 : i32, i32, i32
  }
  func.func @transform_4(%arg0: i32, %arg1: i32) -> (i32, i32, i32) {
    %c0_i32 = arith.constant 0 : i32
    %c0_i32_0 = arith.constant 0 : i32
    %c0_i32_1 = arith.constant 0 : i32
    %c0_i32_2 = arith.constant 0 : i32
    return %c0_i32, %c0_i32_0, %c0_i32_1 : i32, i32, i32
  }
  func.func @transform_5(%arg0: i32, %arg1: i32) -> (i32, i32, i32) {
    %c0_i32 = arith.constant 0 : i32
    %c0_i32_0 = arith.constant 0 : i32
    %c0_i32_1 = arith.constant 0 : i32
    %c0_i32_2 = arith.constant 0 : i32
    return %c0_i32, %c0_i32_0, %c0_i32_1 : i32, i32, i32
  }
  func.func @transform_6(%arg0: i32, %arg1: i32) -> (i32, i32, i32) {
    %c0_i32 = arith.constant 0 : i32
    %c0_i32_0 = arith.constant 0 : i32
    return %arg0, %arg1, %c0_i32 : i32, i32, i32
  }
}

</mosaic_0001>

<bundles_post_ra>
// kernel: tpu_custom_call.1
= control target key start
LH: loop header
LB: loop body
LE: loop exit
PB: predicated region body
PF: predicated region fallthrough
CT: control target
= control target key end

     0   :  { %s2822_s0 = inlined_call_operand.hbm [shape: f32[2,8,32], index: 0, kind: input, shape index: {}]   ;;  %s2823_s1 = inlined_call_operand.hbm [shape: f32[2,8,32], index: 1, kind: input, shape index: {}]   ;;  %s2824_s2 = inlined_call_operand.hbm [shape: f32[2,8,32], index: 2, kind: input, shape index: {}]   ;;  %s2825_s3 = inlined_call_operand.vmem [shape: f32[2,1,8], index: 3, kind: input, shape index: {}]   ;;  %s2826_s4 = inlined_call_operand.hbm [shape: bf16[4,32,32], index: 4, kind: input, shape index: {}]   ;;  %s2827_s5 = inlined_call_operand.vmem [shape: f32[4,1,32], index: 5, kind: input, shape index: {}]   ;;  %s2828_s6 = inlined_call_operand.hbm [shape: f32[2,8,32], index: 6, kind: output, shape index: {}]  }
   0x1   :  { %2837 = sst [smem:[#allocation22_spill]] %s2823_s1 }
   0x2   :  { %11 = vsyncpa [#allocation5], 0 }
   0x3   :  { %13 = vsyncpa [#allocation5 + $0x1], 0 }
   0x4   :  { %14 = vsyncpa [#allocation8], 0 }
   0x5   :  { %16 = vsyncpa [#allocation8 + $0x1], 0 }
   0x6   :  { %17 = vsyncpa [#allocation11], 0 }
   0x7   :  { %18 = vsyncpa [#allocation6], 0 }
   0x8   :  { %20 = vsyncpa [#allocation6 + $0x1], 0  ;;  %s2408_s21 = smov 0   ;;  %s2410_s22 = smov 0  }
   0x9   :  { %s2412_s23 = smov 0   ;;  %s2414_s24 = smov 0  }
   0xa   :  { %s2416_s25 = smov 0   ;;  %s2418_s26 = smov 0  }
   0xb LB: > { %2838 = sst [smem:[#allocation17_spill]] %s2350_s25  ;;  %s38_s27 = sadd.s32 1, %s2350_s25  ;;  %s2354_s26 = sphi %s2418_s26, %s26_s26   ;;  %s2350_s25 = sphi %s2416_s25, %s2861_s25   ;;  %s2346_s24 = sphi %s2414_s24, %s2860_s24   ;;  %s2342_s23 = sphi %s2412_s23, %s2864_s23   ;;  %s2338_s22 = sphi %s2410_s22, %s2863_s22   ;;  %s2334_s21 = sphi %s2408_s21, %s2862_s21  }
   0xc   : > { %2839 = sst [smem:[#allocation18_spill]] %s2354_s26  ;;  %s47_s28 = sadd.s32 1, %s2342_s23 }
   0xd   : > { %p40_p0 = scmp.ge.s32.totalorder %s38_s27, 2  ;;  %p54_p1 = scmp.ne.s32.totalorder %s2342_s23, %s2338_s22 }
   0xe   : > { %p55_p2 = scmp.eq.s32.totalorder %s2354_s26, 0  ;;  %p2068_p5 = scmp.lt.s32.totalorder %s2354_s26, 2 }
   0xf   : > { %s2866_s27 = smov (%p40_p0, %s38_s27), 0  ;;  %s2829_s30 = sand.u32 1, %s2342_s23  }
  0x10   : > { %2840 = sst [smem:[#allocation19_spill]] %s2866_s27  ;;  %p56_p4 = por %p55_p2, %p54_p1 }
  0x11   : > { %s42_s29 = ssub.s32 %s2350_s25, %s2866_s27  ;;  %s2455_s7 = sshll.u32 %s2829_s30, 3 }
  0x12   : > { %p45_p6 = scmp.eq.s32.totalorder %s42_s29, 0  ;;  %s2458_s8 = sshll.u32 %s2350_s25, 7 }
  0x13   : > { %p2460_p7 = pnand %p2068_p5, %p56_p4  ;;  %s267_s11 = sand.u32 1, %s2354_s26  }
  0x14   : > { %s2465_s10 = scalar_select %p45_p6, %s2342_s23, %s47_s28  }
  0x15   : > { %s2843_s1 = sld [smem:[#allocation22_spill]]  ;;  %s271_s15 = scalar_lea.vmem [#allocation7], %s2455_s7 }
  0x16   : > { %2842 = sst [smem:[#allocation20_spill]] %s2465_s10  ;;  %s278_s16 = sshll.u32 %s271_s15, 4  ;;  %s279_s16 = int_to_ptr.vmem [resolvable:$true] %s278_s16 }
  0x17   : > { %s2473_s17 = scalar_lea.sflag [#allocation8], %s267_s11  ;;  %p2831_p8 = pneg %p2460_p7 }
  0x18   : > { %s2169_s18 = scalar_lea.vmem %s279_s16, 128  ;;  %s2356_s19 = smov [#allocation7]  }
  0x19   : > { %p2170_p9 = scmp.ne.s32.totalorder %s279_s16, %s2169_s18  ;;  %s2174_s20 = sshll.u32 %s2356_s19, 4  ;;  %s2175_s20 = int_to_ptr.vmem [resolvable:$false] %s2174_s20 }
  0x1a   : > { %s2176_s28 = scalar_lea.vmem %s2175_s20, 256  ;;  %p2177_p12 = scmp.lt.s32.totalorder %s279_s16, %s2175_s20 }
  0x1b   : > { %s276_s14 = scalar_lea.hbm %s2843_s1, %s2458_s8  ;;  %p2172_p10 = pnand %p2170_p9, %p2831_p8 }
  0x1c   : > { %p2178_p13 = scmp.lt.s32.totalorder %s2176_s28, %s2169_s18 }
  0x1d   : > { %p2173_p11 = pneg %p2172_p10 }
  0x1e   : > { %p2179_p0 = por %p2178_p13, %p2177_p12 }
  0x20   : > { %p2180_p2 = pnand %p2179_p0, %p2173_p11 }
  0x22   : > { %2183 = shalt.err (!%p2180_p2)
}
  0x23   : > { %2059 = dma.hbm_to_vmem [thread:$0]  (!%p2460_p7), %s276_s14, 128, %s279_s16, %s2473_s17  }
  0x24   : > { %s2484_s29 = sadd.s32 4294967295, %s2354_s26   ;;  %s1873_s11 = sadd.s32 4294967294, %s2354_s26  }
  0x25   : > { %p60_p4 = scmp.ne.s32.totalorder %s2338_s22, %s2334_s21  ;;  %p2830_p5 = scmp.eq.s32.totalorder %s2484_s29, 0 }
  0x26   : > { %p206_p6 = scmp.eq.s32.totalorder %s2484_s29, 1  ;;  %p212_p9 = scmp.eq.s32.totalorder %s1873_s11, 1 }
  0x27   : > { %p1874_p10 = scmp.ge.s32.totalorder %s2354_s26, 1  ;;  %p2494_p11 = por %p2830_p5, %p60_p4 }
  0x28   : > { %p2501_p12 = por %p206_p6, %p54_p1  ;;  %p2505_p13 = por %p212_p9, %p60_p4 }
  0x29   : > { %p219_p0 = scmp.lt.s32.totalorder %s2354_s26, 3  ;;  %s2357_s16 = smov [#allocation10]  }
  0x2a   : > { %s2846_s14 = scalar_select %p2505_p13, 1, 0 }
  0x2b   : > { %p2510_p2 = pnand %p1874_p10, %p219_p0  ;;  %s231_s18 = sshll.u32 %s2357_s16, 4  ;;  %s232_s18 = int_to_ptr.vmem [resolvable:$true] %s231_s18 }
  0x2c   : > { %2847 = sst [smem:[#allocation21_spill]] %s2846_s14  ;;  %s252_s30 = scalar_lea.vmem [#allocation4], %s2455_s7 }
  0x2d   : > { %p2049_p3 = pneg %p2510_p2  ;;  %s260_s1 = sshll.u32 %s252_s30, 4  ;;  %s2527_s1 = int_to_ptr.vmem [resolvable:$true] %s260_s1 }
  0x2e   : > { %s2195_s16 = scalar_lea.vmem %s232_s18, 1024  ;;  %p2203_p0 = scmp.lt.s32.totalorder %s232_s18, %s232_s18 }
  0x2f   : > { %p2518_p1 = pnand %p2049_p3, %p2830_p5  ;;  %p2196_p6 = scmp.ne.s32.totalorder %s232_s18, %s2195_s16 }
  0x30   : > { %p2204_p3 = scmp.lt.s32.totalorder %s2195_s16, %s2195_s16 }
  0x31   : > { %p2186_p4 = pneg %p2518_p1 }
  0x32   : > { %p2205_p5 = por %p2204_p3, %p2203_p0 }
  0x33   : > { %p2198_p9 = pnand %p2196_p6, %p2186_p4 }
  0x35   : > { %p2199_p10 = pneg %p2198_p9 }
  0x37   : > { %p2206_p8 = pnand %p2205_p5, %p2199_p10 }
  0x39   : > { %2209 = shalt.err (!%p2206_p8)
}
  0x3a   : > { %s2358_s27 = smov 64   ;;  %s2359_s30 = smov 4  }
  0x3b   : > { %2052 = dma.hbm_to_vmem [thread:$0]  (!%p2518_p1), %s2826_s4, 1024, %s232_s18, [#allocation11], %s2358_s27, %s2358_s27, %s2359_s30  }
  0x3c   : > { %s2850_s11 = sand.u32 1, %s2342_s23   ;;  %s2223_s10 = scalar_lea.vmem %s2527_s1, 128 }
  0x3d   : > { %s249_s25 = scalar_lea.sflag [#allocation5], %s2850_s11  ;;  %p2224_p4 = scmp.ne.s32.totalorder %s2527_s1, %s2223_s10 }
  0x3e   : > { %p2851_p5 = pneg %p2460_p7  ;;  %s2360_s16 = smov [#allocation4]  }
  0x3f   : > { %s2228_s26 = sshll.u32 %s2360_s16, 4  ;;  %s2229_s26 = int_to_ptr.vmem [resolvable:$false] %s2228_s26 }
  0x40   : > { %p2226_p8 = pnand %p2224_p4, %p2851_p5  ;;  %s2230_s14 = scalar_lea.vmem %s2229_s26, 256 }
  0x41   : > { %p2231_p9 = scmp.lt.s32.totalorder %s2527_s1, %s2229_s26  ;;  %p2232_p10 = scmp.lt.s32.totalorder %s2230_s14, %s2223_s10 }
  0x42   : > { %p2227_p6 = pneg %p2226_p8 }
  0x43   : > { %p2233_p0 = por %p2232_p10, %p2231_p9 }
  0x45   : > { %p2234_p3 = pnand %p2233_p0, %p2227_p6 }
  0x47   : > { %2237 = shalt.err (!%p2234_p3)
}
  0x48   : > { %s2852_s19 = scalar_lea.hbm %s2822_s0, %s2458_s8  ;;  %s294_s26 = scalar_lea.hbm %s2824_s2, %s2458_s8 }
  0x49   : > { %2056 = dma.hbm_to_vmem [thread:$0]  (!%p2460_p7), %s2852_s19, 128, %s2527_s1, %s249_s25  }
  0x4a   : > { %s289_s10 = scalar_lea.vmem [#allocation9], %s2455_s7  ;;  %p2853_p4 = pmov %p2851_p5 }
  0x4b   : > { %s296_s14 = sshll.u32 %s289_s10, 4  ;;  %s2361_s28 = smov [#allocation9]   ;;  %s297_s14 = int_to_ptr.vmem [resolvable:$true] %s296_s14 }
  0x4c   : > { %s2251_s20 = scalar_lea.vmem %s297_s14, 128  ;;  %s2256_s16 = sshll.u32 %s2361_s28, 4  ;;  %s2257_s16 = int_to_ptr.vmem [resolvable:$false] %s2256_s16 }
  0x4d   : > { %p2252_p1 = scmp.ne.s32.totalorder %s297_s14, %s2251_s20  ;;  %s2258_s27 = scalar_lea.vmem %s2257_s16, 256 }
  0x4e   : > { %p2259_p6 = scmp.lt.s32.totalorder %s297_s14, %s2257_s16  ;;  %p2260_p9 = scmp.lt.s32.totalorder %s2258_s27, %s2251_s20 }
  0x4f   : > { %p2254_p5 = pnand %p2252_p1, %p2853_p4 }
  0x50   : > { %p2261_p10 = por %p2260_p9, %p2259_p6 }
  0x51   : > { %p2255_p8 = pneg %p2254_p5 }
  0x53   : > { %p2262_p0 = pnand %p2261_p10, %p2255_p8 }
  0x55   : > { %2265 = shalt.err (!%p2262_p0)
}
  0x56   : > { %2062 = dma.hbm_to_vmem [thread:$0]  (!%p2460_p7), %s294_s26, 128, %s297_s14, %s2473_s17  }
  0x57   : > { %311 = sbr.rel (%p2510_p2) target bundleno = 1366 (0x556), region = 44  ;;  %s2566_s1 = sand.u32 (!%p2510_p2), 1, %s2338_s22  }
  0x58   : > { %s2569_s25 = sshll.u32 (!%p2510_p2), %s2566_s1, 3  ;;  %s314_s7 = scalar_lea.sflag (!%p2510_p2), [#allocation5], %s2566_s1 }
  0x59   : > { %s317_s8 = scalar_lea.vmem (!%p2510_p2), [#allocation4], %s2569_s25 }
  0x5c   : > { %2317 = dma.done.wait (%p2494_p11), %s314_s7, 128  }
  0x5d   : > { %2319 = vsyncadd (%p2494_p11), %s314_s7, 4294967168  ;;  %s322_s9 = sand.u32 1, %s2484_s29   ;;  %s326_s15 = scalar_lea.vmem [#allocation7], %s2569_s25 }
  0x5e   : > { %s323_s17 = scalar_lea.sflag [#allocation8], %s322_s9 }
  0x5f   : > { %2321 = dma.done.wait (%p2494_p11), %s323_s17, 256  }
  0x60   : > { %2323 = vsyncadd (%p2494_p11), %s323_s17, 4294967040  ;;  %s335_s18 = scalar_lea.vmem [#allocation9], %s2569_s25  ;;  %p2854_p7 = scmp.eq.s32.totalorder %s2484_s29, 0 }
  0x62   : > { %2325 = dma.done.wait (%p2854_p7), [#allocation11], 1024   ;;  %p2855_p2 = pmov %p2854_p7 }
  0x63   : > { %v2362_v0 = vmov 0.0   ;;  %vm2363_vm0 = vmmov 0   ;;  %v2132_v1 = vld [vmem:[#allocation10 + $0x18] sm:$0xff]   ;;  %v2133_v2 = vld [vmem:[#allocation10 + $0x10] sm:$0xff]   ;;  %v389_v3 = vld [vmem:[%s326_s15] sm:$0xff]  ;;  %vm418_vm1 = vcmask 261120   ;;  %v545_v34 = vlaneseq }
  0x64   : > { %2327 = vsyncadd (%p2855_p2), [#allocation11], 4294966272  ;;  %1957 = vmatprep.subr.bf16.mxu0 %v2362_v0  ;;  %1961 = vmatprep.mubr.msk.bf16.mxu0 %vm2363_vm0, %v2362_v0  ;;  %v390_v4 = vpack.c.bf16 %v389_v3, %v389_v3  ;;  %v2134_v5 = vld [vmem:[#allocation10 + $0x8] sm:$0xff]   ;;  %v2135_v7 = vld [vmem:[#allocation10] sm:$0xff]   ;;  %s2364_s19 = smov 104   ;;  %s2365_s11 = smov 120  }
  0x65   : > { %1965 = vmatprep.subr.bf16.mxu1 %v2362_v0  ;;  %1969 = vmatprep.mubr.msk.bf16.mxu1 %vm2363_vm0, %v2362_v0  ;;  %v2136_v6 = vld [vmem:[#allocation10 + $0x28] sm:$0xff]   ;;  %v839_v8 = vld [vmem:[%s317_s8] sm:$0xff]  ;;  %v2137_v10 = vld [vmem:[#allocation10 + $0x20] sm:$0xff]   ;;  %s2366_s10 = smov 112   ;;  %v2367_v32 = vmov 1983009808  }
  0x66   : > { %1958 = vmatpush3.bf16.msra.mxu0 %v2132_v1  ;;  %1966 = vmatpush3.bf16.msra.mxu1 %v2136_v6  ;;  %v840_v9 = vpack.c.bf16 %v839_v8, %v839_v8  ;;  %v391_v11 = vld [vmem:[%s335_s18] sm:$0xff]  ;;  %v543_v33 = vunpack.c.l.s4 %v2367_v32  ;;  %v2368_v35 = vmov 1934713408   ;;  %v546_v38 = vshrl.u32 %v545_v34, 7  ;;  %p381_p11 = scmp.lt.s32.totalorder %s2346_s24, 1  ;;  %s2369_s8 = smov 16  }
  0x67   : > { %1959 = vmatprep.subr.bf16.mxu0 %v2362_v0  ;;  %1967 = vmatprep.subr.bf16.mxu1 %v2362_v0  ;;  %v392_v12 = vpack.c.bf16 %v391_v11, %v391_v11  ;;  %v1890_v13 = vld [vmem:[%s2827_s5 + $0x1] ss:$0 sm:$0xff]  ;;  %v1903_v19 = vld [vmem:[%s2827_s5] ss:$0 sm:$0xff]  ;;  %v1895_v26 = vld [vmem:[%s2827_s5 + $0x2] ss:$0 sm:$0xff]  ;;  %v575_v36 = vunpack.c.l.s4 %v2368_v35 }
  0x68   : > { %v544_v37 = vunpack.c.0.s8 %v543_v33  ;;  %vm680_vm2 = vcmask 60416   ;;  %vm1070_vm3 = vcmask 64512   ;;  %vm1302_vm4 = vcmask 1043456   ;;  %s382_s28 = scalar_select %p381_p11, %s2346_s24, 1 }
  0x69   : > { %v576_v41 = vunpack.c.0.s8 %v575_v36  ;;  %s2370_s9 = smov 8   ;;  %s2371_s17 = smov 24   ;;  %vm1641_vm5 = vcmask 130048   ;;  %vm1643_vm6 = vcmask 195584  }
  0x6a   : > { %1960 = vmatpush3.bf16.msra.mxu0 %v2133_v2  ;;  %1968 = vmatpush3.bf16.msra.mxu1 %v2137_v10  ;;  %v2632_v42 = vsub.s32 %v544_v37, %v546_v38  ;;  %s383_s7 = scalar_lea.vmem %s2825_s3, %s382_s28  ;;  %s1926_s29 = sshll.u32 %s2346_s24, 7 }
  0x6b   : > { %1973 = vmatprep.subr.bf16.mxu0 %v2362_v0  ;;  %1981 = vmatprep.subr.bf16.mxu1 %v2362_v0  ;;  %v2634_v48 = vsub.s32 %v576_v41, %v546_v38  ;;  %s380_s12 = scalar_lea.vmem [#allocation12], %s2569_s25  ;;  %s2773_s26 = scalar_lea.hbm %s2828_s6, %s1926_s29 }
  0x6c   : > { %s2372_s25 = smov [#allocation12]  }
  0x6d   : > { %1962 = vmatmul.mubr.msk.bf16.vlgmr.msra.gmra.mxu0 %vm418_vm1, %v390_v4  ;;  %1970 = vmatmul.mubr.msk.bf16.vlgmr.msra.gmra.mxu1 %vm418_vm1, %v392_v12  ;;  %s2270_s14 = sshll.u32 %s2372_s25, 4  ;;  %s2271_s14 = int_to_ptr.vmem [resolvable:$false] %s2270_s14 }
  0x6e   : > { %1974 = vmatpush3.bf16.msra.mxu0 %v2134_v5  ;;  %1977 = vmatprep.mubr.msk.bf16.mxu0 %vm2363_vm0, %v2362_v0  ;;  %s2272_s20 = scalar_lea.vmem %s2271_s14, 256 }
  0x6f   : > { %1975 = vmatprep.subr.bf16.mxu0 %v2362_v0  ;;  %1983 = vmatprep.mubr.msk.bf16.mxu1 %vm2363_vm0, %v2362_v0 }
  0x72   : > { %1976 = vmatpush3.bf16.msra.mxu0 %v2135_v7 }
  0x73   : > { %1987 = vmatprep.subr.bf16.mxu0 %v2362_v0 }
  0x75   : > { %1978 = vmatmul.mubr.msk.bf16.vlgmr.msra.gmra.mxu0 %vm418_vm1, %v840_v9 }
  0x76   : > { %1989 = vmatprep.mubr.msk.bf16.mxu0 %vm2363_vm0, %v2362_v0 }
 0x12d   : > { %v456_v14 = vpop.f32.mrf.mxu0  ;;  %v524_v27 = vpop.f32.mrf.mxu1 }
 0x12e   : > { %v457_v15 = vadd.f32 %v1890_v13, %v456_v14  ;;  %v2627_v28 = vadd.f32 %v1895_v26, %v524_v27 }
 0x12f   : > { %v1963_v16 = vpop.f32.mrf.mxu0  ;;  %v1971_v29 = vpop.f32.mrf.mxu1 }
 0x130   : > { %537 = vrot.lane.b32.xlu1 %v457_v15, %s2364_s19  ;;  %531 = vrot.lane.b32.xlu0 %v457_v15, %s2365_s11 }
 0x131   : > { %v459_v17 = vpop.f32.mrf.mxu0  ;;  %v527_v30 = vpop.f32.mrf.mxu1 }
 0x133   : > { %v1964_v18 = vpop.f32.mrf.mxu0  ;;  %v1972_v31 = vpop.f32.mrf.mxu1 }
 0x134   : > { %534 = vrot.lane.b32.xlu0 %v457_v15, %s2366_s10 }
 0x135   : > { %v902_v20 = vpop.f32.mrf.mxu0 }
 0x136   : > { %v903_v21 = vadd.f32 %v1903_v19, %v902_v20 }
 0x137   : > { %v1979_v22 = vpop.f32.mrf.mxu0 }
 0x138   : > { %v2619_v23 = vmul.f32 0.35355338, %v903_v21 }
 0x139   : > { %v905_v24 = vpop.f32.mrf.mxu0 }
 0x13a   : > { %913 = vrot.lane.b32.xlu0 %v2619_v23, %s2366_s10  ;;  %910 = vrot.lane.b32.xlu1 %v2619_v23, %s2365_s11 }
 0x13b   : > { %v1980_v25 = vpop.f32.mrf.mxu0 }
 0x13e   : > { %916 = vrot.lane.b32.xlu1 %v2619_v23, %s2364_s19  ;;  %686 = vrot.lane.b32.xlu0 %v2627_v28, %s2365_s11 }
 0x142   : > { %689 = vrot.lane.b32.xlu1 %v2627_v28, %s2366_s10  ;;  %692 = vrot.lane.b32.xlu0 %v2627_v28, %s2364_s19  ;;  %s1730_s19 = sshll.u32 %s380_s12, 4  ;;  %s1716_s10 = scalar_lea.sflag [#allocation6], %s2566_s1  ;;  %s2775_s19 = int_to_ptr.vmem [resolvable:$true] %s1730_s19 }
 0x143   : > { %s2266_s24 = scalar_lea.vmem %s2775_s19, 128  ;;  %p2273_p5 = scmp.lt.s32.totalorder %s2775_s19, %s2271_s14 }
 0x144   : > { %p2267_p3 = scmp.ne.s32.totalorder %s2775_s19, %s2266_s24  ;;  %p2274_p8 = scmp.lt.s32.totalorder %s2272_s20, %s2266_s24 }
 0x146   : > { %p2268_p1 = pnand %p2267_p3, %p2501_p12  ;;  %p2275_p6 = por %p2274_p8, %p2273_p5 }
 0x148   : > { %p2269_p4 = pneg %p2268_p1 }
 0x14a   : > { %p2276_p9 = pnand %p2275_p6, %p2269_p4 }
 0x1a2   : > { %v538_v39 = vpop.permute.xlu1 %537  ;;  %v532_v40 = vpop.permute.xlu0 %531 }
 0x1a3   : > { %v556_v43 = vcombine.low %v532_v40, %v538_v39  ;;  %v557_v44 = vcombine.high %v532_v40, %v538_v39 }
 0x1a5   : > { %v564_v49 = vrot.slane %v556_v43, %v2632_v42  ;;  %v571_v50 = vrot.slane %v557_v44, %v2632_v42 }
 0x1a6   : > { %v535_v45 = vpop.permute.xlu0 %534 }
 0x1a7   : > { %v540_v46 = vcombine.low %v457_v15, %v535_v45  ;;  %v541_v47 = vcombine.high %v457_v15, %v535_v45 }
 0x1a9   : > { %v548_v51 = vrot.slane %v540_v46, %v2632_v42  ;;  %v555_v52 = vrot.slane %v541_v47, %v2632_v42 }
 0x1ab   : > { %v572_v53 = vcombine.low %v548_v51, %v564_v49  ;;  %v573_v54 = vcombine.high %v548_v51, %v564_v49  ;;  %v588_v55 = vcombine.low %v555_v52, %v571_v50  ;;  %v589_v56 = vcombine.high %v555_v52, %v571_v50 }
 0x1ac   : > { %v911_v57 = vpop.permute.xlu1 %910  ;;  %v914_v62 = vpop.permute.xlu0 %913 }
 0x1ad   : > { %v580_v58 = vrot.slane %v572_v53, %v2634_v48  ;;  %v587_v59 = vrot.slane %v573_v54, %v2634_v48  ;;  %v596_v60 = vrot.slane %v588_v55, %v2634_v48  ;;  %v603_v61 = vrot.slane %v589_v56, %v2634_v48 }
 0x1ae   : > { %v919_v4 = vcombine.low %v2619_v23, %v914_v62  ;;  %v920_v5 = vcombine.high %v2619_v23, %v914_v62 }
 0x1af   : > { %v608_v63 = vcombine.low %v580_v58, %v587_v59  ;;  %v1899_v1 = vcombine.high %v580_v58, %v587_v59  ;;  %v624_v2 = vcombine.low %v596_v60, %v603_v61  ;;  %v1900_v3 = vcombine.high %v596_v60, %v603_v61 }
 0x1b0   : > { %v917_v6 = vpop.permute.xlu1 %916  ;;  %v927_v17 = vrot.slane %v919_v4, %v2632_v42  ;;  %v934_v18 = vrot.slane %v920_v5, %v2632_v42 }
 0x1b1   : > { %v615_v7 = vrot.slane %v608_v63, %v2632_v42  ;;  %v623_v8 = vrot.slane %v1899_v1, %v2632_v42  ;;  %v631_v9 = vrot.slane %v624_v2, %v2632_v42  ;;  %v639_v10 = vrot.slane %v1900_v3, %v2632_v42 }
 0x1b2   : > { %v935_v11 = vcombine.low %v911_v57, %v917_v6  ;;  %v936_v12 = vcombine.high %v911_v57, %v917_v6 }
 0x1b3   : > { %v640_v13 = vcombine.low %v615_v7, %v623_v8  ;;  %v641_v14 = vcombine.high %v615_v7, %v623_v8  ;;  %v656_v15 = vcombine.low %v631_v9, %v639_v10  ;;  %v657_v16 = vcombine.high %v631_v9, %v639_v10 }
 0x1b4   : > { %v943_v19 = vrot.slane %v935_v11, %v2632_v42  ;;  %v950_v20 = vrot.slane %v936_v12, %v2632_v42 }
 0x1b5   : > { %v648_v21 = vrot.slane %v640_v13, %v2634_v48  ;;  %v655_v22 = vrot.slane %v641_v14, %v2634_v48  ;;  %v664_v23 = vrot.slane %v656_v15, %v2634_v48  ;;  %v671_v24 = vrot.slane %v657_v16, %v2634_v48  ;;  %v687_v13 = vpop.permute.xlu0 %686  ;;  %v690_v14 = vpop.permute.xlu1 %689 }
 0x1b6   : > { %v951_v25 = vcombine.low %v927_v17, %v943_v19  ;;  %v952_v26 = vcombine.high %v927_v17, %v943_v19  ;;  %v967_v27 = vcombine.low %v934_v18, %v950_v20  ;;  %v968_v29 = vcombine.high %v934_v18, %v950_v20 }
 0x1b7   : > { %v672_v30 = vcombine.low %v648_v21, %v664_v23  ;;  %v673_v31 = vcombine.high %v648_v21, %v664_v23  ;;  %v674_v32 = vcombine.low %v655_v22, %v671_v24  ;;  %v675_v33 = vcombine.high %v655_v22, %v671_v24 }
 0x1b8   : > { %v959_v34 = vrot.slane %v951_v25, %v2634_v48  ;;  %v966_v35 = vrot.slane %v952_v26, %v2634_v48  ;;  %v975_v36 = vrot.slane %v967_v27, %v2634_v48  ;;  %v982_v37 = vrot.slane %v968_v29, %v2634_v48 }
 0x1b9   : > { %v676_v38 = vpack.c.bf16 %v672_v30, %v672_v30  ;;  %v677_v39 = vpack.c.bf16 %v673_v31, %v673_v31  ;;  %v678_v40 = vpack.c.bf16 %v674_v32, %v674_v32  ;;  %v679_v41 = vpack.c.bf16 %v675_v33, %v675_v33  ;;  %v693_v17 = vpop.permute.xlu0 %692 }
 0x1ba   : > { %v987_v43 = vcombine.low %v959_v34, %v966_v35  ;;  %v1907_v44 = vcombine.high %v959_v34, %v966_v35  ;;  %v1003_v45 = vcombine.low %v975_v36, %v982_v37  ;;  %v1908_v46 = vcombine.high %v975_v36, %v982_v37 }
 0x1bb   : > { %681 = vst.msk [vmem:[#allocation2] sm:$0xf] %vm680_vm2, %v676_v38  ;;  %682 = vst.msk [vmem:[#allocation2 + $0x4] sm:$0xf] %vm680_vm2, %v677_v39  ;;  %v695_v15 = vcombine.low %v2627_v28, %v690_v14  ;;  %v696_v16 = vcombine.high %v2627_v28, %v690_v14  ;;  %v711_v18 = vcombine.low %v687_v13, %v693_v17 }
 0x1bc   : > { %683 = vst.msk [vmem:[#allocation2 + $0x8] sm:$0xf] %vm680_vm2, %v678_v40  ;;  %684 = vst.msk [vmem:[#allocation2 + $0xc] sm:$0xf] %vm680_vm2, %v679_v41  ;;  %v994_v47 = vrot.slane %v987_v43, %v2632_v42  ;;  %v1002_v49 = vrot.slane %v1907_v44, %v2632_v42  ;;  %v1010_v50 = vrot.slane %v1003_v45, %v2632_v42 }
 0x1bd   : > { %v1018_v51 = vrot.slane %v1908_v46, %v2632_v42  ;;  %v712_v19 = vcombine.high %v687_v13, %v693_v17  ;;  %v703_v20 = vrot.slane %v695_v15, %v2632_v42  ;;  %v710_v21 = vrot.slane %v696_v16, %v2632_v42 }
 0x1be   : > { %v1019_v52 = vcombine.low %v994_v47, %v1002_v49  ;;  %v1020_v60 = vcombine.high %v994_v47, %v1002_v49  ;;  %v719_v22 = vrot.slane %v711_v18, %v2632_v42 }
 0x1bf   : > { %v1035_v53 = vcombine.low %v1010_v50, %v1018_v51  ;;  %v1036_v61 = vcombine.high %v1010_v50, %v1018_v51  ;;  %v726_v23 = vrot.slane %v712_v19, %v2632_v42 }
 0x1c0   : > { %v1027_v54 = vrot.slane %v1019_v52, %v2634_v48  ;;  %v1034_v5 = vrot.slane %v1020_v60, %v2634_v48  ;;  %v727_v24 = vcombine.low %v703_v20, %v719_v22  ;;  %v728_v25 = vcombine.high %v703_v20, %v719_v22 }
 0x1c1   : > { %v1043_v55 = vrot.slane %v1035_v53, %v2634_v48  ;;  %v1050_v6 = vrot.slane %v1036_v61, %v2634_v48  ;;  %v743_v26 = vcombine.low %v710_v21, %v726_v23  ;;  %v744_v27 = vcombine.high %v710_v21, %v726_v23 }
 0x1c2   : > { %v1060_v56 = vld [vmem:[#allocation2] sm:$0xf]  ;;  %v1061_v57 = vld [vmem:[#allocation2 + $0x4] sm:$0xf]  ;;  %v735_v29 = vrot.slane %v727_v24, %v2634_v48  ;;  %v742_v30 = vrot.slane %v728_v25, %v2634_v48 }
 0x1c3   : > { %v1075_v58 = vsel %vm1070_vm3, %v1060_v56, 0  ;;  %v1121_v59 = vsel %vm1070_vm3, %v1061_v57, 0  ;;  %v1051_v62 = vcombine.low %v1027_v54, %v1043_v55  ;;  %v1052_v63 = vcombine.high %v1027_v54, %v1043_v55  ;;  %v1062_v1 = vld [vmem:[#allocation2 + $0x8] sm:$0xf]  ;;  %v1063_v2 = vld [vmem:[#allocation2 + $0xc] sm:$0xf] }
 0x1c4   : > { %1982 = vmatpush3.bf16.xpose.msra.mxu1 %v1075_v58  ;;  %1988 = vmatpush3.bf16.xpose.msra.mxu0 %v1121_v59  ;;  %v1167_v7 = vsel %vm1070_vm3, %v1062_v1, 0  ;;  %v1213_v8 = vsel %vm1070_vm3, %v1063_v2, 0  ;;  %v1053_v9 = vcombine.low %v1034_v5, %v1050_v6  ;;  %v1054_v10 = vcombine.high %v1034_v5, %v1050_v6 }
 0x1c5   : > { %1993 = vmatprep.subr.bf16.mxu1 %v2362_v0  ;;  %1999 = vmatprep.subr.bf16.mxu0 %v2362_v0  ;;  %v1055_v3 = vpack.c.bf16 %v1051_v62, %v1051_v62  ;;  %v1056_v4 = vpack.c.bf16 %v1052_v63, %v1052_v63  ;;  %v751_v28 = vrot.slane %v743_v26, %v2634_v48  ;;  %v1909_v62 = vld [vmem:[%s383_s7] ss:$0 sm:$0xff] }
 0x1c6   : > { %v1057_v11 = vpack.c.bf16 %v1053_v9, %v1053_v9  ;;  %v1058_v12 = vpack.c.bf16 %v1054_v10, %v1054_v10  ;;  %v758_v31 = vrot.slane %v744_v27, %v2634_v48  ;;  %v763_v32 = vcombine.low %v735_v29, %v742_v30 }
 0x1c7   : > { %v1901_v33 = vcombine.high %v735_v29, %v742_v30 }
 0x1c8   : > { %v779_v34 = vcombine.low %v751_v28, %v758_v31  ;;  %v1902_v35 = vcombine.high %v751_v28, %v758_v31  ;;  %v770_v36 = vrot.slane %v763_v32, %v2632_v42 }
 0x1c9   : > { %v778_v37 = vrot.slane %v1901_v33, %v2632_v42 }
 0x1ca   : > { %v786_v38 = vrot.slane %v779_v34, %v2632_v42  ;;  %v794_v39 = vrot.slane %v1902_v35, %v2632_v42 }
 0x1cb   : > { %1984 = vmatmul.mubr.msk.bf16.vlgmr.msra.gmra.mxu1 %vm1070_vm3, %v1055_v3  ;;  %1990 = vmatmul.mubr.msk.bf16.vlgmr.msra.gmra.mxu0 %vm1070_vm3, %v1056_v4  ;;  %v795_v40 = vcombine.low %v770_v36, %v778_v37  ;;  %v796_v41 = vcombine.high %v770_v36, %v778_v37 }
 0x1cc   : > { %1994 = vmatpush3.bf16.xpose.msra.mxu1 %v1167_v7  ;;  %2000 = vmatpush3.bf16.xpose.msra.mxu0 %v1213_v8  ;;  %v811_v43 = vcombine.low %v786_v38, %v794_v39  ;;  %v812_v44 = vcombine.high %v786_v38, %v794_v39 }
 0x1cd   : > { %1995 = vmatprep.mubr.msk.bf16.mxu1 %vm2363_vm0, %v2362_v0  ;;  %2001 = vmatprep.mubr.msk.bf16.mxu0 %vm2363_vm0, %v2362_v0  ;;  %v803_v45 = vrot.slane %v795_v40, %v2634_v48  ;;  %v810_v46 = vrot.slane %v796_v41, %v2634_v48 }
 0x1ce   : > { %2005 = vmatprep.subr.bf16.mxu1 %v2362_v0  ;;  %2011 = vmatprep.subr.bf16.mxu0 %v2362_v0  ;;  %v819_v47 = vrot.slane %v811_v43, %v2634_v48  ;;  %v826_v49 = vrot.slane %v812_v44, %v2634_v48 }
 0x1d0   : > { %v827_v50 = vcombine.low %v803_v45, %v819_v47  ;;  %v828_v51 = vcombine.high %v803_v45, %v819_v47  ;;  %v829_v52 = vcombine.low %v810_v46, %v826_v49  ;;  %v830_v53 = vcombine.high %v810_v46, %v826_v49 }
 0x1d2   : > { %v831_v54 = vpack.c.bf16 %v827_v50, %v827_v50  ;;  %v832_v55 = vpack.c.bf16 %v828_v51, %v828_v51  ;;  %v833_v56 = vpack.c.bf16 %v829_v52, %v829_v52  ;;  %v834_v57 = vpack.c.bf16 %v830_v53, %v830_v53 }
 0x1d3   : > { %1996 = vmatmul.mubr.msk.bf16.vlgmr.msra.gmra.mxu1 %vm1070_vm3, %v1057_v11  ;;  %2002 = vmatmul.mubr.msk.bf16.vlgmr.msra.gmra.mxu0 %vm1070_vm3, %v1058_v12 }
 0x1d4   : > { %2007 = vmatprep.mubr.msk.bf16.mxu1 %vm2363_vm0, %v2362_v0  ;;  %2013 = vmatprep.mubr.msk.bf16.mxu0 %vm2363_vm0, %v2362_v0  ;;  %835 = vst.msk [vmem:[#allocation3] sm:$0xf] %vm680_vm2, %v831_v54  ;;  %836 = vst.msk [vmem:[#allocation3 + $0x4] sm:$0xf] %vm680_vm2, %v832_v55 }
 0x1d5   : > { %837 = vst.msk [vmem:[#allocation3 + $0x8] sm:$0xf] %vm680_vm2, %v833_v56  ;;  %838 = vst.msk [vmem:[#allocation3 + $0xc] sm:$0xf] %vm680_vm2, %v834_v57 }
 0x1db   : > { %v1295_v58 = vld [vmem:[#allocation3] sm:$0xf]  ;;  %v1296_v59 = vld [vmem:[#allocation3 + $0x4] sm:$0xf] }
 0x1dc   : > { %v1304_v60 = vsel %vm1302_vm4, %v1295_v58, 0  ;;  %v1350_v61 = vsel %vm1302_vm4, %v1296_v59, 0  ;;  %v1297_v37 = vld [vmem:[#allocation3 + $0x8] sm:$0xf]  ;;  %v1298_v41 = vld [vmem:[#allocation3 + $0xc] sm:$0xf] }
 0x1dd   : > { %2006 = vmatpush3.bf16.msra.mxu1 %v1304_v60  ;;  %2012 = vmatpush3.bf16.msra.mxu0 %v1350_v61  ;;  %v1396_v45 = vsel %vm1302_vm4, %v1297_v37, 0  ;;  %v1442_v46 = vsel %vm1302_vm4, %v1298_v41, 0 }
 0x1de   : > { %2017 = vmatprep.subr.bf16.mxu1 %v2362_v0  ;;  %2023 = vmatprep.subr.bf16.mxu0 %v2362_v0 }
 0x28b   : > { %v1111_v63 = vpop.f32.mrf.mxu1  ;;  %v1157_v1 = vpop.f32.mrf.mxu0 }
 0x28c   : > { %v1112_v2 = vadd.f32 %v1909_v62, %v1111_v63  ;;  %v1158_v3 = vadd.f32 %v1909_v62, %v1157_v1 }
 0x28d   : > { %v1985_v4 = vpop.f32.mrf.mxu1  ;;  %v1991_v5 = vpop.f32.mrf.mxu0 }
 0x28e   : > { %v1255_v6 = vsel %vm1070_vm3, %v1112_v2, -inf  ;;  %v1258_v7 = vsel %vm1070_vm3, %v1158_v3, -inf }
 0x28f   : > { %1256 = vmax.xlane.f32.xlu1 %v1255_v6  ;;  %v1114_v8 = vpop.f32.mrf.mxu1  ;;  %1259 = vmax.xlane.f32.xlu0 %v1258_v7  ;;  %v1160_v9 = vpop.f32.mrf.mxu0 }
 0x291   : > { %v1986_v10 = vpop.f32.mrf.mxu1  ;;  %v1992_v11 = vpop.f32.mrf.mxu0 }
 0x293   : > { %v1203_v12 = vpop.f32.mrf.mxu1  ;;  %v1249_v13 = vpop.f32.mrf.mxu0 }
 0x294   : > { %v1204_v14 = vadd.f32 %v1909_v62, %v1203_v12  ;;  %v1250_v15 = vadd.f32 %v1909_v62, %v1249_v13 }
 0x295   : > { %v1997_v16 = vpop.f32.mrf.mxu1  ;;  %v2003_v17 = vpop.f32.mrf.mxu0 }
 0x296   : > { %v1261_v18 = vsel %vm1070_vm3, %v1204_v14, -inf  ;;  %v1264_v19 = vsel %vm1070_vm3, %v1250_v15, -inf }
 0x297   : > { %v1206_v20 = vpop.f32.mrf.mxu1  ;;  %1262 = vmax.xlane.f32.xlu0 %v1261_v18  ;;  %1265 = vmax.xlane.f32.xlu1 %v1264_v19  ;;  %v1252_v21 = vpop.f32.mrf.mxu0 }
 0x299   : > { %v1998_v22 = vpop.f32.mrf.mxu1  ;;  %v2004_v23 = vpop.f32.mrf.mxu0 }
 0x318   : > { %v1257_v24 = vpop.xlane.xlu1 %1256  ;;  %v1260_v25 = vpop.xlane.xlu0 %1259 }
 0x319   : > { %v1267_v26 = vsub.f32 %v1112_v2, %v1257_v24  ;;  %v1268_v27 = vsub.f32 %v1158_v3, %v1260_v25 }
 0x31b   : > { %v1271_v29 = vmul.f32 1.442695, %v1267_v26  ;;  %v1273_v30 = vmul.f32 1.442695, %v1268_v27 }
 0x31d   : > { %2140 = vpow2.f32 %v1271_v29 }
 0x31e   : > { %2142 = vpow2.f32 %v1273_v30 }
 0x320   : > { %v1263_v28 = vpop.xlane.xlu0 %1262  ;;  %v1266_v31 = vpop.xlane.xlu1 %1265 }
 0x321   : > { %v1269_v32 = vsub.f32 %v1204_v14, %v1263_v28  ;;  %v1270_v33 = vsub.f32 %v1250_v15, %v1266_v31  ;;  %v2138_v31 = vld [vmem:[#allocation10 + $0x38] sm:$0xff]  }
 0x323   : > { %v1275_v34 = vmul.f32 1.442695, %v1269_v32  ;;  %v1277_v35 = vmul.f32 1.442695, %v1270_v33 }
 0x325   : > { %2144 = vpow2.f32 %v1275_v34 }
 0x326   : > { %2146 = vpow2.f32 %v1277_v35 }
 0x32a   : > { %v2141_v36 = vpop.eup %2140 }
 0x32b   : > { %v2143_v38 = vpop.eup %2142  ;;  %v1279_v39 = vsel %vm1070_vm3, %v2141_v36, 0.0  ;;  %v1291_v40 = vpack.c.bf16 %v2141_v36, %v2141_v36 }
 0x32c   : > { %1280 = vadd.xlane.f32.xlu0 %v1279_v39  ;;  %v1282_v43 = vsel %vm1070_vm3, %v2143_v38, 0.0  ;;  %v1292_v44 = vpack.c.bf16 %v2143_v38, %v2143_v38 }
 0x32d   : > { %1283 = vadd.xlane.f32.xlu1 %v1282_v43  ;;  %2008 = vmatmul.mubr.msk.bf16.vlgmr.msra.gmra.mxu1 %vm1070_vm3, %v1291_v40  ;;  %v2139_v40 = vld [vmem:[#allocation10 + $0x30] sm:$0xff]  }
 0x32e   : > { %2014 = vmatmul.mubr.msk.bf16.vlgmr.msra.gmra.mxu0 %vm1070_vm3, %v1292_v44  ;;  %2018 = vmatpush3.bf16.msra.mxu1 %v1396_v45 }
 0x32f   : > { %2024 = vmatpush3.bf16.msra.mxu0 %v1442_v46  ;;  %2019 = vmatprep.mubr.msk.bf16.mxu1 %vm2363_vm0, %v2362_v0 }
 0x330   : > { %2025 = vmatprep.mubr.msk.bf16.mxu0 %vm2363_vm0, %v2362_v0  ;;  %2029 = vmatprep.subr.bf16.mxu1 %v2362_v0 }
 0x332   : > { %v2145_v47 = vpop.eup %2144 }
 0x333   : > { %v2147_v49 = vpop.eup %2146  ;;  %v1285_v50 = vsel %vm1070_vm3, %v2145_v47, 0.0  ;;  %v1293_v51 = vpack.c.bf16 %v2145_v47, %v2145_v47 }
 0x334   : > { %1286 = vadd.xlane.f32.xlu0 %v1285_v50  ;;  %v1288_v52 = vsel %vm1070_vm3, %v2147_v49, 0.0  ;;  %v1294_v53 = vpack.c.bf16 %v2147_v49, %v2147_v49 }
 0x335   : > { %1289 = vadd.xlane.f32.xlu1 %v1288_v52  ;;  %2020 = vmatmul.mubr.msk.bf16.vlgmr.msra.gmra.mxu1 %vm1070_vm3, %v1293_v51 }
 0x336   : > { %2026 = vmatmul.mubr.msk.bf16.vlgmr.msra.gmra.mxu0 %vm1070_vm3, %v1294_v53  ;;  %2033 = vmatprep.mubr.msk.bf16.mxu1 %vm2363_vm0, %v2362_v0 }
 0x337   : > { %2030 = vmatpush3.bf16.msra.mxu1 %v2138_v31 }
 0x338   : > { %2031 = vmatprep.subr.bf16.mxu1 %v2362_v0 }
 0x33b   : > { %2032 = vmatpush3.bf16.msra.mxu1 %v2139_v40 }
 0x3b5   : > { %v1281_v54 = vpop.xlane.xlu0 %1280 }
 0x3b6   : > { %v1284_v55 = vpop.xlane.xlu1 %1283  ;;  %2148 = vrcp.f32 %v1281_v54 }
 0x3b7   : > { %2150 = vrcp.f32 %v1284_v55 }
 0x3bd   : > { %v1287_v56 = vpop.xlane.xlu0 %1286 }
 0x3be   : > { %v1290_v57 = vpop.xlane.xlu1 %1289  ;;  %2152 = vrcp.f32 %v1287_v56 }
 0x3bf   : > { %2154 = vrcp.f32 %v1290_v57 }
 0x3c3   : > { %v2149_v1 = vpop.eup %2148 }
 0x3c4   : > { %v2151_v3 = vpop.eup %2150 }
 0x3cb   : > { %v2153_v5 = vpop.eup %2152 }
 0x3cc   : > { %v2155_v7 = vpop.eup %2154 }
 0x3ed   : > { %v1340_v58 = vpop.f32.mrf.mxu1 }
 0x3ee   : > { %v1386_v59 = vpop.f32.mrf.mxu0  ;;  %v1488_v8 = vmul.f32 %v2149_v1, %v1340_v58 }
 0x3ef   : > { %v2009_v60 = vpop.f32.mrf.mxu1  ;;  %v1489_v11 = vmul.f32 %v2151_v3, %v1386_v59 }
 0x3f0   : > { %v2015_v61 = vpop.f32.mrf.mxu0 }
 0x3f1   : > { %v1343_v62 = vpop.f32.mrf.mxu1 }
 0x3f2   : > { %v1389_v63 = vpop.f32.mrf.mxu0 }
 0x3f3   : > { %v2010_v2 = vpop.f32.mrf.mxu1  ;;  %v1921_v63 = vld [vmem:[%s2827_s5 + $0x3] ss:$0 sm:$0xff] }
 0x3f4   : > { %v2016_v4 = vpop.f32.mrf.mxu0 }
 0x3f5   : > { %v1432_v6 = vpop.f32.mrf.mxu1 }
 0x3f6   : > { %v1490_v9 = vmul.f32 %v2153_v5, %v1432_v6  ;;  %v1478_v10 = vpop.f32.mrf.mxu0 }
 0x3f7   : > { %v1491_v12 = vmul.f32 %v2155_v7, %v1478_v10  ;;  %v2021_v13 = vpop.f32.mrf.mxu1 }
 0x3f8   : > { %v1492_v14 = vcombine.low %v1488_v8, %v1490_v9  ;;  %v1493_v15 = vcombine.high %v1488_v8, %v1490_v9  ;;  %v2027_v16 = vpop.f32.mrf.mxu0 }
 0x3f9   : > { %v1508_v17 = vcombine.low %v1489_v11, %v1491_v12  ;;  %v1509_v18 = vcombine.high %v1489_v11, %v1491_v12  ;;  %v1435_v19 = vpop.f32.mrf.mxu1 }
 0x3fa   : > { %v1500_v20 = vrot.slane %v1492_v14, %v2632_v42  ;;  %v1507_v21 = vrot.slane %v1493_v15, %v2632_v42  ;;  %v1481_v22 = vpop.f32.mrf.mxu0 }
 0x3fb   : > { %v1516_v23 = vrot.slane %v1508_v17, %v2632_v42  ;;  %v1523_v24 = vrot.slane %v1509_v18, %v2632_v42  ;;  %v2022_v25 = vpop.f32.mrf.mxu1 }
 0x3fc   : > { %v2028_v26 = vpop.f32.mrf.mxu0 }
 0x3fd   : > { %v1524_v27 = vcombine.low %v1500_v20, %v1516_v23  ;;  %v1525_v29 = vcombine.high %v1500_v20, %v1516_v23  ;;  %v1540_v30 = vcombine.low %v1507_v21, %v1523_v24  ;;  %v1541_v28 = vcombine.high %v1507_v21, %v1523_v24 }
 0x3ff   : > { %v1532_v32 = vrot.slane %v1524_v27, %v2634_v48  ;;  %v1539_v33 = vrot.slane %v1525_v29, %v2634_v48  ;;  %v1548_v34 = vrot.slane %v1540_v30, %v2634_v48  ;;  %v1555_v35 = vrot.slane %v1541_v28, %v2634_v48 }
 0x401   : > { %v1560_v36 = vcombine.low %v1532_v32, %v1539_v33  ;;  %v1918_v37 = vcombine.high %v1532_v32, %v1539_v33  ;;  %v1576_v38 = vcombine.low %v1548_v34, %v1555_v35  ;;  %v1919_v39 = vcombine.high %v1548_v34, %v1555_v35 }
 0x403   : > { %v1567_v41 = vrot.slane %v1560_v36, %v2632_v42  ;;  %v1575_v43 = vrot.slane %v1918_v37, %v2632_v42  ;;  %v1583_v44 = vrot.slane %v1576_v38, %v2632_v42  ;;  %v1591_v45 = vrot.slane %v1919_v39, %v2632_v42 }
 0x405   : > { %v1593_v46 = vcombine.high %v1567_v41, %v1575_v43  ;;  %v1609_v47 = vcombine.high %v1583_v44, %v1591_v45  ;;  %v1592_v49 = vcombine.low %v1567_v41, %v1575_v43  ;;  %v1608_v50 = vcombine.low %v1583_v44, %v1591_v45 }
 0x407   : > { %v1607_v0 = vrot.slane %v1593_v46, %v2634_v48  ;;  %v1623_v51 = vrot.slane %v1609_v47, %v2634_v48  ;;  %v1600_v52 = vrot.slane %v1592_v49, %v2634_v48  ;;  %v1616_v53 = vrot.slane %v1608_v50, %v2634_v48 }
 0x409   : > { %v1626_v54 = vcombine.low %v1607_v0, %v1623_v51  ;;  %v1625_v55 = vcombine.high %v1600_v52, %v1616_v53  ;;  %v1624_v56 = vcombine.low %v1600_v52, %v1616_v53  ;;  %v1627_v42 = vcombine.high %v1607_v0, %v1623_v51 }
 0x40b   : > { %1633 = vrot.lane.b32.xlu1 %v1626_v54, %s2369_s8  ;;  %1629 = vrot.lane.b32.xlu0 %v1625_v55, %s2370_s9 }
 0x40f   : > { %1637 = vrot.lane.b32.xlu1 %v1627_v42, %s2371_s17 }
 0x47d   : > { %v1634_v57 = vpop.permute.xlu1 %1633  ;;  %v1630_v58 = vpop.permute.xlu0 %1629 }
 0x47e   : > { %v1640_v59 = vsel %vm1070_vm3, %v1624_v56, %v1630_v58 }
 0x47f   : > { %v1642_v48 = vsel %vm1641_vm5, %v1640_v59, %v1634_v57 }
 0x481   : > { %v1638_v60 = vpop.permute.xlu1 %1637 }
 0x482   : > { %v1644_v61 = vsel %vm1643_vm6, %v1642_v48, %v1638_v60 }
 0x483   : > { %v1645_v62 = vpack.c.bf16 %v1644_v61, %v1644_v61 }
 0x485   : > { %2034 = vmatmul.mubr.msk.bf16.vlgmr.msra.gmra.mxu1 %vm418_vm1, %v1645_v62 }
 0x545   : > { %v1708_v1 = vpop.f32.mrf.mxu1 }
 0x546   : > { %v1709_v2 = vadd.f32 %v1921_v63, %v1708_v1 }
 0x547   : > { %v2035_v3 = vpop.f32.mrf.mxu1 }
 0x548   : > { %1714 = vst.msk [vmem:[%s380_s12] sm:$0xff] %vm418_vm1, %v1709_v2 }
 0x549   : > { %v1711_v4 = vpop.f32.mrf.mxu1 }
 0x54a   : > { %2279 = shalt.err (!%p2276_p9)
}
 0x54b   : > { %s2280_s28 = scalar_lea.hbm %s2773_s26, 128  ;;  %s2284_s27 = scalar_lea.hbm %s2828_s6, 256 }
 0x54c   : > { %p2281_p10 = scmp.ne.s32.totalorder %s2773_s26, %s2280_s28  ;;  %p2285_p2 = scmp.lt.s32.totalorder %s2773_s26, %s2828_s6 }
 0x54d   : > { %p2286_p11 = scmp.lt.s32.totalorder %s2284_s27, %s2280_s28 }
 0x54e   : > { %p2282_p0 = pnand %p2281_p10, %p2501_p12 }
 0x54f   : > { %p2287_p3 = por %p2286_p11, %p2285_p2 }
 0x550   : > { %p2283_p7 = pneg %p2282_p0 }
 0x552   : > { %p2288_p1 = pnand %p2287_p3, %p2283_p7 }
 0x554   : > { %2291 = shalt.err (!%p2288_p1)
}
 0x555   : > { %2047 = dma.vmem_to_hbm [thread:$0]  (%p2501_p12), %s2775_s19, 128, %s2773_s26, %s1716_s10   ;;  %v2036_v5 = vpop.f32.mrf.mxu1 }
 0x556 PF: > { %s2857_s17 = sld [smem:[#allocation18_spill]]  ;;  %s1742_s15 = sand.u32 1, %s2334_s21  }
 0x557   : > { %s1743_s18 = scalar_lea.sflag [#allocation6], %s1742_s15 }
 0x55c   : > { %p2858_p4 = scmp.ge.s32.totalorder %s2857_s17, 2 }
 0x55e   : > { %p2064_p5 = pnand %p2858_p4, %p2505_p13 }
 0x560   : > { %p2065_p8 = pneg %p2064_p5 }
 0x562   : > { %2329 = dma.done.wait (%p2065_p8), %s1743_s18, 128  }
 0x563   : > { %2331 = vsyncadd (%p2065_p8), %s1743_s18, 4294967168  ;;  %s26_s26 = sadd.s32 1, %s2857_s17   ;;  %s2859_s13 = sld [smem:[#allocation20_spill]] }
 0x564   : > { %p23_p6 = scmp.ge.s32.totalorder %s26_s26, 4   ;;  %s2860_s24 = sld [smem:[#allocation17_spill]] }
 0x565   : > { %s2861_s25 = sld [smem:[#allocation19_spill]]  ;;  %s2862_s21 = smov %s2338_s22 }
 0x566   : > { %s2863_s22 = smov %s2342_s23  ;;  %25 = sbr.rel (!%p23_p6) target bundleno = 11 (0xb), region = 130 }
 0x569   : > { %s2864_s23 = smov %s2859_s13 }
 0x56b   :  { %1748 = vsyncpa [#allocation5], 1 }
 0x56c   :  { %1750 = vsyncpa [#allocation5 + $0x1], 1 }
 0x56d   :  { %1751 = vsyncpa [#allocation8], 1 }
 0x56e   :  { %1753 = vsyncpa [#allocation8 + $0x1], 1 }
 0x56f   :  { %1754 = vsyncpa [#allocation11], 1 }
 0x570   :  { %1755 = vsyncpa [#allocation6], 1 }
 0x571   :  { %1757 = vsyncpa [#allocation6 + $0x1], 1 }

// kernel: tpu_custom_call.1
= control target key start
LH: loop header
LB: loop body
LE: loop exit
PB: predicated region body
PF: predicated region fallthrough
CT: control target
= control target key end

     0   :  { %s2822_s0 = inlined_call_operand.hbm [shape: f32[2,8,32], index: 0, kind: input, shape index: {}]   ;;  %s2823_s1 = inlined_call_operand.hbm [shape: f32[2,8,32], index: 1, kind: input, shape index: {}]   ;;  %s2824_s2 = inlined_call_operand.hbm [shape: f32[2,8,32], index: 2, kind: input, shape index: {}]   ;;  %s2825_s3 = inlined_call_operand.vmem [shape: f32[2,1,8], index: 3, kind: input, shape index: {}]   ;;  %s2826_s4 = inlined_call_operand.hbm [shape: bf16[4,32,32], index: 4, kind: input, shape index: {}]   ;;  %s2827_s5 = inlined_call_operand.vmem [shape: f32[4,1,32], index: 5, kind: input, shape index: {}]   ;;  %s2828_s6 = inlined_call_operand.hbm [shape: f32[2,8,32], index: 6, kind: output, shape index: {}]  }
   0x1   :  { %2837 = sst [smem:[#allocation22_spill]] %s2823_s1 }
   0x2   :  { %11 = vsyncpa [#allocation5], 0 }
   0x3   :  { %13 = vsyncpa [#allocation5 + $0x1], 0 }
   0x4   :  { %14 = vsyncpa [#allocation8], 0 }
   0x5   :  { %16 = vsyncpa [#allocation8 + $0x1], 0 }
   0x6   :  { %17 = vsyncpa [#allocation11], 0 }
   0x7   :  { %18 = vsyncpa [#allocation6], 0 }
   0x8   :  { %20 = vsyncpa [#allocation6 + $0x1], 0  ;;  %s2408_s21 = smov 0   ;;  %s2410_s22 = smov 0  }
   0x9   :  { %s2412_s23 = smov 0   ;;  %s2414_s24 = smov 0  }
   0xa   :  { %s2416_s25 = smov 0   ;;  %s2418_s26 = smov 0  }
   0xb LB: > { %2838 = sst [smem:[#allocation17_spill]] %s2350_s25  ;;  %s38_s27 = sadd.s32 1, %s2350_s25  ;;  %s2354_s26 = sphi %s2418_s26, %s26_s26   ;;  %s2350_s25 = sphi %s2416_s25, %s2861_s25   ;;  %s2346_s24 = sphi %s2414_s24, %s2860_s24   ;;  %s2342_s23 = sphi %s2412_s23, %s2864_s23   ;;  %s2338_s22 = sphi %s2410_s22, %s2863_s22   ;;  %s2334_s21 = sphi %s2408_s21, %s2862_s21  }
   0xc   : > { %2839 = sst [smem:[#allocation18_spill]] %s2354_s26  ;;  %s47_s28 = sadd.s32 1, %s2342_s23 }
   0xd   : > { %p40_p0 = scmp.ge.s32.totalorder %s38_s27, 2  ;;  %p54_p1 = scmp.ne.s32.totalorder %s2342_s23, %s2338_s22 }
   0xe   : > { %p55_p2 = scmp.eq.s32.totalorder %s2354_s26, 0  ;;  %p2068_p5 = scmp.lt.s32.totalorder %s2354_s26, 2 }
   0xf   : > { %s2866_s27 = smov (%p40_p0, %s38_s27), 0  ;;  %s2829_s30 = sand.u32 1, %s2342_s23  }
  0x10   : > { %2840 = sst [smem:[#allocation19_spill]] %s2866_s27  ;;  %p56_p4 = por %p55_p2, %p54_p1 }
  0x11   : > { %s42_s29 = ssub.s32 %s2350_s25, %s2866_s27  ;;  %s2455_s7 = sshll.u32 %s2829_s30, 3 }
  0x12   : > { %p45_p6 = scmp.eq.s32.totalorder %s42_s29, 0  ;;  %s2458_s8 = sshll.u32 %s2350_s25, 7 }
  0x13   : > { %p2460_p7 = pnand %p2068_p5, %p56_p4  ;;  %s267_s11 = sand.u32 1, %s2354_s26  }
  0x14   : > { %s2465_s10 = scalar_select %p45_p6, %s2342_s23, %s47_s28  }
  0x15   : > { %s2843_s1 = sld [smem:[#allocation22_spill]]  ;;  %s271_s15 = scalar_lea.vmem [#allocation7], %s2455_s7 }
  0x16   : > { %2842 = sst [smem:[#allocation20_spill]] %s2465_s10  ;;  %s278_s16 = sshll.u32 %s271_s15, 4  ;;  %s279_s16 = int_to_ptr.vmem [resolvable:$true] %s278_s16 }
  0x17   : > { %s2473_s17 = scalar_lea.sflag [#allocation8], %s267_s11  ;;  %p2831_p8 = pneg %p2460_p7 }
  0x18   : > { %s2169_s18 = scalar_lea.vmem %s279_s16, 128  ;;  %s2356_s19 = smov [#allocation7]  }
  0x19   : > { %p2170_p9 = scmp.ne.s32.totalorder %s279_s16, %s2169_s18  ;;  %s2174_s20 = sshll.u32 %s2356_s19, 4  ;;  %s2175_s20 = int_to_ptr.vmem [resolvable:$false] %s2174_s20 }
  0x1a   : > { %s2176_s28 = scalar_lea.vmem %s2175_s20, 256  ;;  %p2177_p12 = scmp.lt.s32.totalorder %s279_s16, %s2175_s20 }
  0x1b   : > { %s276_s14 = scalar_lea.hbm %s2843_s1, %s2458_s8  ;;  %p2172_p10 = pnand %p2170_p9, %p2831_p8 }
  0x1c   : > { %p2178_p13 = scmp.lt.s32.totalorder %s2176_s28, %s2169_s18 }
  0x1d   : > { %p2173_p11 = pneg %p2172_p10 }
  0x1e   : > { %p2179_p0 = por %p2178_p13, %p2177_p12 }
  0x20   : > { %p2180_p2 = pnand %p2179_p0, %p2173_p11 }
  0x22   : > { %2183 = shalt.err (!%p2180_p2)
}
  0x23   : > { %2059 = dma.hbm_to_vmem [thread:$0]  (!%p2460_p7), %s276_s14, 128, %s279_s16, %s2473_s17  }
  0x24   : > { %s2484_s29 = sadd.s32 4294967295, %s2354_s26   ;;  %s1873_s11 = sadd.s32 4294967294, %s2354_s26  }
  0x25   : > { %p60_p4 = scmp.ne.s32.totalorder %s2338_s22, %s2334_s21  ;;  %p2830_p5 = scmp.eq.s32.totalorder %s2484_s29, 0 }
  0x26   : > { %p206_p6 = scmp.eq.s32.totalorder %s2484_s29, 1  ;;  %p212_p9 = scmp.eq.s32.totalorder %s1873_s11, 1 }
  0x27   : > { %p1874_p10 = scmp.ge.s32.totalorder %s2354_s26, 1  ;;  %p2494_p11 = por %p2830_p5, %p60_p4 }
  0x28   : > { %p2501_p12 = por %p206_p6, %p54_p1  ;;  %p2505_p13 = por %p212_p9, %p60_p4 }
  0x29   : > { %p219_p0 = scmp.lt.s32.totalorder %s2354_s26, 3  ;;  %s2357_s16 = smov [#allocation10]  }
  0x2a   : > { %s2846_s14 = scalar_select %p2505_p13, 1, 0 }
  0x2b   : > { %p2510_p2 = pnand %p1874_p10, %p219_p0  ;;  %s231_s18 = sshll.u32 %s2357_s16, 4  ;;  %s232_s18 = int_to_ptr.vmem [resolvable:$true] %s231_s18 }
  0x2c   : > { %2847 = sst [smem:[#allocation21_spill]] %s2846_s14  ;;  %s252_s30 = scalar_lea.vmem [#allocation4], %s2455_s7 }
  0x2d   : > { %p2049_p3 = pneg %p2510_p2  ;;  %s260_s1 = sshll.u32 %s252_s30, 4  ;;  %s2527_s1 = int_to_ptr.vmem [resolvable:$true] %s260_s1 }
  0x2e   : > { %s2195_s16 = scalar_lea.vmem %s232_s18, 1024  ;;  %p2203_p0 = scmp.lt.s32.totalorder %s232_s18, %s232_s18 }
  0x2f   : > { %p2518_p1 = pnand %p2049_p3, %p2830_p5  ;;  %p2196_p6 = scmp.ne.s32.totalorder %s232_s18, %s2195_s16 }
  0x30   : > { %p2204_p3 = scmp.lt.s32.totalorder %s2195_s16, %s2195_s16 }
  0x31   : > { %p2186_p4 = pneg %p2518_p1 }
  0x32   : > { %p2205_p5 = por %p2204_p3, %p2203_p0 }
  0x33   : > { %p2198_p9 = pnand %p2196_p6, %p2186_p4 }
  0x35   : > { %p2199_p10 = pneg %p2198_p9 }
  0x37   : > { %p2206_p8 = pnand %p2205_p5, %p2199_p10 }
  0x39   : > { %2209 = shalt.err (!%p2206_p8)
}
  0x3a   : > { %s2358_s27 = smov 64   ;;  %s2359_s30 = smov 4  }
  0x3b   : > { %2052 = dma.hbm_to_vmem [thread:$0]  (!%p2518_p1), %s2826_s4, 1024, %s232_s18, [#allocation11], %s2358_s27, %s2358_s27, %s2359_s30  }
  0x3c   : > { %s2850_s11 = sand.u32 1, %s2342_s23   ;;  %s2223_s10 = scalar_lea.vmem %s2527_s1, 128 }
  0x3d   : > { %s249_s25 = scalar_lea.sflag [#allocation5], %s2850_s11  ;;  %p2224_p4 = scmp.ne.s32.totalorder %s2527_s1, %s2223_s10 }
  0x3e   : > { %p2851_p5 = pneg %p2460_p7  ;;  %s2360_s16 = smov [#allocation4]  }
  0x3f   : > { %s2228_s26 = sshll.u32 %s2360_s16, 4  ;;  %s2229_s26 = int_to_ptr.vmem [resolvable:$false] %s2228_s26 }
  0x40   : > { %p2226_p8 = pnand %p2224_p4, %p2851_p5  ;;  %s2230_s14 = scalar_lea.vmem %s2229_s26, 256 }
  0x41   : > { %p2231_p9 = scmp.lt.s32.totalorder %s2527_s1, %s2229_s26  ;;  %p2232_p10 = scmp.lt.s32.totalorder %s2230_s14, %s2223_s10 }
  0x42   : > { %p2227_p6 = pneg %p2226_p8 }
  0x43   : > { %p2233_p0 = por %p2232_p10, %p2231_p9 }
  0x45   : > { %p2234_p3 = pnand %p2233_p0, %p2227_p6 }
  0x47   : > { %2237 = shalt.err (!%p2234_p3)
}
  0x48   : > { %s2852_s19 = scalar_lea.hbm %s2822_s0, %s2458_s8  ;;  %s294_s26 = scalar_lea.hbm %s2824_s2, %s2458_s8 }
  0x49   : > { %2056 = dma.hbm_to_vmem [thread:$0]  (!%p2460_p7), %s2852_s19, 128, %s2527_s1, %s249_s25  }
  0x4a   : > { %s289_s10 = scalar_lea.vmem [#allocation9], %s2455_s7  ;;  %p2853_p4 = pmov %p2851_p5 }
  0x4b   : > { %s296_s14 = sshll.u32 %s289_s10, 4  ;;  %s2361_s28 = smov [#allocation9]   ;;  %s297_s14 = int_to_ptr.vmem [resolvable:$true] %s296_s14 }
  0x4c   : > { %s2251_s20 = scalar_lea.vmem %s297_s14, 128  ;;  %s2256_s16 = sshll.u32 %s2361_s28, 4  ;;  %s2257_s16 = int_to_ptr.vmem [resolvable:$false] %s2256_s16 }
  0x4d   : > { %p2252_p1 = scmp.ne.s32.totalorder %s297_s14, %s2251_s20  ;;  %s2258_s27 = scalar_lea.vmem %s2257_s16, 256 }
  0x4e   : > { %p2259_p6 = scmp.lt.s32.totalorder %s297_s14, %s2257_s16  ;;  %p2260_p9 = scmp.lt.s32.totalorder %s2258_s27, %s2251_s20 }
  0x4f   : > { %p2254_p5 = pnand %p2252_p1, %p2853_p4 }
  0x50   : > { %p2261_p10 = por %p2260_p9, %p2259_p6 }
  0x51   : > { %p2255_p8 = pneg %p2254_p5 }
  0x53   : > { %p2262_p0 = pnand %p2261_p10, %p2255_p8 }
  0x55   : > { %2265 = shalt.err (!%p2262_p0)
}
  0x56   : > { %2062 = dma.hbm_to_vmem [thread:$0]  (!%p2460_p7), %s294_s26, 128, %s297_s14, %s2473_s17  }
  0x57   : > { %311 = sbr.rel (%p2510_p2) target bundleno = 1366 (0x556), region = 44  ;;  %s2566_s1 = sand.u32 (!%p2510_p2), 1, %s2338_s22  }
  0x58   : > { %s2569_s25 = sshll.u32 (!%p2510_p2), %s2566_s1, 3  ;;  %s314_s7 = scalar_lea.sflag (!%p2510_p2), [#allocation5], %s2566_s1 }
  0x59   : > { %s317_s8 = scalar_lea.vmem (!%p2510_p2), [#allocation4], %s2569_s25 }
  0x5c   : > { %2317 = dma.done.wait (%p2494_p11), %s314_s7, 128  }
  0x5d   : > { %2319 = vsyncadd (%p2494_p11), %s314_s7, 4294967168  ;;  %s322_s9 = sand.u32 1, %s2484_s29   ;;  %s326_s15 = scalar_lea.vmem [#allocation7], %s2569_s25 }
  0x5e   : > { %s323_s17 = scalar_lea.sflag [#allocation8], %s322_s9 }
  0x5f   : > { %2321 = dma.done.wait (%p2494_p11), %s323_s17, 256  }
  0x60   : > { %2323 = vsyncadd (%p2494_p11), %s323_s17, 4294967040  ;;  %s335_s18 = scalar_lea.vmem [#allocation9], %s2569_s25  ;;  %p2854_p7 = scmp.eq.s32.totalorder %s2484_s29, 0 }
  0x62   : > { %2325 = dma.done.wait (%p2854_p7), [#allocation11], 1024   ;;  %p2855_p2 = pmov %p2854_p7 }
  0x63   : > { %v2362_v0 = vmov 0.0   ;;  %vm2363_vm0 = vmmov 0   ;;  %v2132_v1 = vld [vmem:[#allocation10 + $0x18] sm:$0xff]   ;;  %v2133_v2 = vld [vmem:[#allocation10 + $0x10] sm:$0xff]   ;;  %v389_v3 = vld [vmem:[%s326_s15] sm:$0xff]  ;;  %vm418_vm1 = vcmask 261120   ;;  %v545_v34 = vlaneseq }
  0x64   : > { %2327 = vsyncadd (%p2855_p2), [#allocation11], 4294966272  ;;  %1957 = vmatprep.subr.bf16.mxu0 %v2362_v0  ;;  %1961 = vmatprep.mubr.msk.bf16.mxu0 %vm2363_vm0, %v2362_v0  ;;  %v390_v4 = vpack.c.bf16 %v389_v3, %v389_v3  ;;  %v2134_v5 = vld [vmem:[#allocation10 + $0x8] sm:$0xff]   ;;  %v2135_v7 = vld [vmem:[#allocation10] sm:$0xff]   ;;  %s2364_s19 = smov 104   ;;  %s2365_s11 = smov 120  }
  0x65   : > { %1965 = vmatprep.subr.bf16.mxu1 %v2362_v0  ;;  %1969 = vmatprep.mubr.msk.bf16.mxu1 %vm2363_vm0, %v2362_v0  ;;  %v2136_v6 = vld [vmem:[#allocation10 + $0x28] sm:$0xff]   ;;  %v839_v8 = vld [vmem:[%s317_s8] sm:$0xff]  ;;  %v2137_v10 = vld [vmem:[#allocation10 + $0x20] sm:$0xff]   ;;  %s2366_s10 = smov 112   ;;  %v2367_v32 = vmov 1983009808  }
  0x66   : > { %1958 = vmatpush3.bf16.msra.mxu0 %v2132_v1  ;;  %1966 = vmatpush3.bf16.msra.mxu1 %v2136_v6  ;;  %v840_v9 = vpack.c.bf16 %v839_v8, %v839_v8  ;;  %v391_v11 = vld [vmem:[%s335_s18] sm:$0xff]  ;;  %v543_v33 = vunpack.c.l.s4 %v2367_v32  ;;  %v2368_v35 = vmov 1934713408   ;;  %v546_v38 = vshrl.u32 %v545_v34, 7  ;;  %p381_p11 = scmp.lt.s32.totalorder %s2346_s24, 1  ;;  %s2369_s8 = smov 16  }
  0x67   : > { %1959 = vmatprep.subr.bf16.mxu0 %v2362_v0  ;;  %1967 = vmatprep.subr.bf16.mxu1 %v2362_v0  ;;  %v392_v12 = vpack.c.bf16 %v391_v11, %v391_v11  ;;  %v1890_v13 = vld [vmem:[%s2827_s5 + $0x1] ss:$0 sm:$0xff]  ;;  %v1903_v19 = vld [vmem:[%s2827_s5] ss:$0 sm:$0xff]  ;;  %v1895_v26 = vld [vmem:[%s2827_s5 + $0x2] ss:$0 sm:$0xff]  ;;  %v575_v36 = vunpack.c.l.s4 %v2368_v35 }
  0x68   : > { %v544_v37 = vunpack.c.0.s8 %v543_v33  ;;  %vm680_vm2 = vcmask 60416   ;;  %vm1070_vm3 = vcmask 64512   ;;  %vm1302_vm4 = vcmask 1043456   ;;  %s382_s28 = scalar_select %p381_p11, %s2346_s24, 1 }
  0x69   : > { %v576_v41 = vunpack.c.0.s8 %v575_v36  ;;  %s2370_s9 = smov 8   ;;  %s2371_s17 = smov 24   ;;  %vm1641_vm5 = vcmask 130048   ;;  %vm1643_vm6 = vcmask 195584  }
  0x6a   : > { %1960 = vmatpush3.bf16.msra.mxu0 %v2133_v2  ;;  %1968 = vmatpush3.bf16.msra.mxu1 %v2137_v10  ;;  %v2632_v42 = vsub.s32 %v544_v37, %v546_v38  ;;  %s383_s7 = scalar_lea.vmem %s2825_s3, %s382_s28  ;;  %s1926_s29 = sshll.u32 %s2346_s24, 7 }
  0x6b   : > { %1973 = vmatprep.subr.bf16.mxu0 %v2362_v0  ;;  %1981 = vmatprep.subr.bf16.mxu1 %v2362_v0  ;;  %v2634_v48 = vsub.s32 %v576_v41, %v546_v38  ;;  %s380_s12 = scalar_lea.vmem [#allocation12], %s2569_s25  ;;  %s2773_s26 = scalar_lea.hbm %s2828_s6, %s1926_s29 }
  0x6c   : > { %s2372_s25 = smov [#allocation12]  }
  0x6d   : > { %1962 = vmatmul.mubr.msk.bf16.vlgmr.msra.gmra.mxu0 %vm418_vm1, %v390_v4  ;;  %1970 = vmatmul.mubr.msk.bf16.vlgmr.msra.gmra.mxu1 %vm418_vm1, %v392_v12  ;;  %s2270_s14 = sshll.u32 %s2372_s25, 4  ;;  %s2271_s14 = int_to_ptr.vmem [resolvable:$false] %s2270_s14 }
  0x6e   : > { %1974 = vmatpush3.bf16.msra.mxu0 %v2134_v5  ;;  %1977 = vmatprep.mubr.msk.bf16.mxu0 %vm2363_vm0, %v2362_v0  ;;  %s2272_s20 = scalar_lea.vmem %s2271_s14, 256 }
  0x6f   : > { %1975 = vmatprep.subr.bf16.mxu0 %v2362_v0  ;;  %1983 = vmatprep.mubr.msk.bf16.mxu1 %vm2363_vm0, %v2362_v0 }
  0x72   : > { %1976 = vmatpush3.bf16.msra.mxu0 %v2135_v7 }
  0x73   : > { %1987 = vmatprep.subr.bf16.mxu0 %v2362_v0 }
  0x75   : > { %1978 = vmatmul.mubr.msk.bf16.vlgmr.msra.gmra.mxu0 %vm418_vm1, %v840_v9 }
  0x76   : > { %1989 = vmatprep.mubr.msk.bf16.mxu0 %vm2363_vm0, %v2362_v0 }
 0x12d   : > { %v456_v14 = vpop.f32.mrf.mxu0  ;;  %v524_v27 = vpop.f32.mrf.mxu1 }
 0x12e   : > { %v457_v15 = vadd.f32 %v1890_v13, %v456_v14  ;;  %v2627_v28 = vadd.f32 %v1895_v26, %v524_v27 }
 0x12f   : > { %v1963_v16 = vpop.f32.mrf.mxu0  ;;  %v1971_v29 = vpop.f32.mrf.mxu1 }
 0x130   : > { %537 = vrot.lane.b32.xlu1 %v457_v15, %s2364_s19  ;;  %531 = vrot.lane.b32.xlu0 %v457_v15, %s2365_s11 }
 0x131   : > { %v459_v17 = vpop.f32.mrf.mxu0  ;;  %v527_v30 = vpop.f32.mrf.mxu1 }
 0x133   : > { %v1964_v18 = vpop.f32.mrf.mxu0  ;;  %v1972_v31 = vpop.f32.mrf.mxu1 }
 0x134   : > { %534 = vrot.lane.b32.xlu0 %v457_v15, %s2366_s10 }
 0x135   : > { %v902_v20 = vpop.f32.mrf.mxu0 }
 0x136   : > { %v903_v21 = vadd.f32 %v1903_v19, %v902_v20 }
 0x137   : > { %v1979_v22 = vpop.f32.mrf.mxu0 }
 0x138   : > { %v2619_v23 = vmul.f32 0.35355338, %v903_v21 }
 0x139   : > { %v905_v24 = vpop.f32.mrf.mxu0 }
 0x13a   : > { %913 = vrot.lane.b32.xlu0 %v2619_v23, %s2366_s10  ;;  %910 = vrot.lane.b32.xlu1 %v2619_v23, %s2365_s11 }
 0x13b   : > { %v1980_v25 = vpop.f32.mrf.mxu0 }
 0x13e   : > { %916 = vrot.lane.b32.xlu1 %v2619_v23, %s2364_s19  ;;  %686 = vrot.lane.b32.xlu0 %v2627_v28, %s2365_s11 }
 0x142   : > { %689 = vrot.lane.b32.xlu1 %v2627_v28, %s2366_s10  ;;  %692 = vrot.lane.b32.xlu0 %v2627_v28, %s2364_s19  ;;  %s1730_s19 = sshll.u32 %s380_s12, 4  ;;  %s1716_s10 = scalar_lea.sflag [#allocation6], %s2566_s1  ;;  %s2775_s19 = int_to_ptr.vmem [resolvable:$true] %s1730_s19 }
 0x143   : > { %s2266_s24 = scalar_lea.vmem %s2775_s19, 128  ;;  %p2273_p5 = scmp.lt.s32.totalorder %s2775_s19, %s2271_s14 }
 0x144   : > { %p2267_p3 = scmp.ne.s32.totalorder %s2775_s19, %s2266_s24  ;;  %p2274_p8 = scmp.lt.s32.totalorder %s2272_s20, %s2266_s24 }
 0x146   : > { %p2268_p1 = pnand %p2267_p3, %p2501_p12  ;;  %p2275_p6 = por %p2274_p8, %p2273_p5 }
 0x148   : > { %p2269_p4 = pneg %p2268_p1 }
 0x14a   : > { %p2276_p9 = pnand %p2275_p6, %p2269_p4 }
 0x1a2   : > { %v538_v39 = vpop.permute.xlu1 %537  ;;  %v532_v40 = vpop.permute.xlu0 %531 }
 0x1a3   : > { %v556_v43 = vcombine.low %v532_v40, %v538_v39  ;;  %v557_v44 = vcombine.high %v532_v40, %v538_v39 }
 0x1a5   : > { %v564_v49 = vrot.slane %v556_v43, %v2632_v42  ;;  %v571_v50 = vrot.slane %v557_v44, %v2632_v42 }
 0x1a6   : > { %v535_v45 = vpop.permute.xlu0 %534 }
 0x1a7   : > { %v540_v46 = vcombine.low %v457_v15, %v535_v45  ;;  %v541_v47 = vcombine.high %v457_v15, %v535_v45 }
 0x1a9   : > { %v548_v51 = vrot.slane %v540_v46, %v2632_v42  ;;  %v555_v52 = vrot.slane %v541_v47, %v2632_v42 }
 0x1ab   : > { %v572_v53 = vcombine.low %v548_v51, %v564_v49  ;;  %v573_v54 = vcombine.high %v548_v51, %v564_v49  ;;  %v588_v55 = vcombine.low %v555_v52, %v571_v50  ;;  %v589_v56 = vcombine.high %v555_v52, %v571_v50 }
 0x1ac   : > { %v911_v57 = vpop.permute.xlu1 %910  ;;  %v914_v62 = vpop.permute.xlu0 %913 }
 0x1ad   : > { %v580_v58 = vrot.slane %v572_v53, %v2634_v48  ;;  %v587_v59 = vrot.slane %v573_v54, %v2634_v48  ;;  %v596_v60 = vrot.slane %v588_v55, %v2634_v48  ;;  %v603_v61 = vrot.slane %v589_v56, %v2634_v48 }
 0x1ae   : > { %v919_v4 = vcombine.low %v2619_v23, %v914_v62  ;;  %v920_v5 = vcombine.high %v2619_v23, %v914_v62 }
 0x1af   : > { %v608_v63 = vcombine.low %v580_v58, %v587_v59  ;;  %v1899_v1 = vcombine.high %v580_v58, %v587_v59  ;;  %v624_v2 = vcombine.low %v596_v60, %v603_v61  ;;  %v1900_v3 = vcombine.high %v596_v60, %v603_v61 }
 0x1b0   : > { %v917_v6 = vpop.permute.xlu1 %916  ;;  %v927_v17 = vrot.slane %v919_v4, %v2632_v42  ;;  %v934_v18 = vrot.slane %v920_v5, %v2632_v42 }
 0x1b1   : > { %v615_v7 = vrot.slane %v608_v63, %v2632_v42  ;;  %v623_v8 = vrot.slane %v1899_v1, %v2632_v42  ;;  %v631_v9 = vrot.slane %v624_v2, %v2632_v42  ;;  %v639_v10 = vrot.slane %v1900_v3, %v2632_v42 }
 0x1b2   : > { %v935_v11 = vcombine.low %v911_v57, %v917_v6  ;;  %v936_v12 = vcombine.high %v911_v57, %v917_v6 }
 0x1b3   : > { %v640_v13 = vcombine.low %v615_v7, %v623_v8  ;;  %v641_v14 = vcombine.high %v615_v7, %v623_v8  ;;  %v656_v15 = vcombine.low %v631_v9, %v639_v10  ;;  %v657_v16 = vcombine.high %v631_v9, %v639_v10 }
 0x1b4   : > { %v943_v19 = vrot.slane %v935_v11, %v2632_v42  ;;  %v950_v20 = vrot.slane %v936_v12, %v2632_v42 }
 0x1b5   : > { %v648_v21 = vrot.slane %v640_v13, %v2634_v48  ;;  %v655_v22 = vrot.slane %v641_v14, %v2634_v48  ;;  %v664_v23 = vrot.slane %v656_v15, %v2634_v48  ;;  %v671_v24 = vrot.slane %v657_v16, %v2634_v48  ;;  %v687_v13 = vpop.permute.xlu0 %686  ;;  %v690_v14 = vpop.permute.xlu1 %689 }
 0x1b6   : > { %v951_v25 = vcombine.low %v927_v17, %v943_v19  ;;  %v952_v26 = vcombine.high %v927_v17, %v943_v19  ;;  %v967_v27 = vcombine.low %v934_v18, %v950_v20  ;;  %v968_v29 = vcombine.high %v934_v18, %v950_v20 }
 0x1b7   : > { %v672_v30 = vcombine.low %v648_v21, %v664_v23  ;;  %v673_v31 = vcombine.high %v648_v21, %v664_v23  ;;  %v674_v32 = vcombine.low %v655_v22, %v671_v24  ;;  %v675_v33 = vcombine.high %v655_v22, %v671_v24 }
 0x1b8   : > { %v959_v34 = vrot.slane %v951_v25, %v2634_v48  ;;  %v966_v35 = vrot.slane %v952_v26, %v2634_v48  ;;  %v975_v36 = vrot.slane %v967_v27, %v2634_v48  ;;  %v982_v37 = vrot.slane %v968_v29, %v2634_v48 }
 0x1b9   : > { %v676_v38 = vpack.c.bf16 %v672_v30, %v672_v30  ;;  %v677_v39 = vpack.c.bf16 %v673_v31, %v673_v31  ;;  %v678_v40 = vpack.c.bf16 %v674_v32, %v674_v32  ;;  %v679_v41 = vpack.c.bf16 %v675_v33, %v675_v33  ;;  %v693_v17 = vpop.permute.xlu0 %692 }
 0x1ba   : > { %v987_v43 = vcombine.low %v959_v34, %v966_v35  ;;  %v1907_v44 = vcombine.high %v959_v34, %v966_v35  ;;  %v1003_v45 = vcombine.low %v975_v36, %v982_v37  ;;  %v1908_v46 = vcombine.high %v975_v36, %v982_v37 }
 0x1bb   : > { %681 = vst.msk [vmem:[#allocation2] sm:$0xf] %vm680_vm2, %v676_v38  ;;  %682 = vst.msk [vmem:[#allocation2 + $0x4] sm:$0xf] %vm680_vm2, %v677_v39  ;;  %v695_v15 = vcombine.low %v2627_v28, %v690_v14  ;;  %v696_v16 = vcombine.high %v2627_v28, %v690_v14  ;;  %v711_v18 = vcombine.low %v687_v13, %v693_v17 }
 0x1bc   : > { %683 = vst.msk [vmem:[#allocation2 + $0x8] sm:$0xf] %vm680_vm2, %v678_v40  ;;  %684 = vst.msk [vmem:[#allocation2 + $0xc] sm:$0xf] %vm680_vm2, %v679_v41  ;;  %v994_v47 = vrot.slane %v987_v43, %v2632_v42  ;;  %v1002_v49 = vrot.slane %v1907_v44, %v2632_v42  ;;  %v1010_v50 = vrot.slane %v1003_v45, %v2632_v42 }
 0x1bd   : > { %v1018_v51 = vrot.slane %v1908_v46, %v2632_v42  ;;  %v712_v19 = vcombine.high %v687_v13, %v693_v17  ;;  %v703_v20 = vrot.slane %v695_v15, %v2632_v42  ;;  %v710_v21 = vrot.slane %v696_v16, %v2632_v42 }
 0x1be   : > { %v1019_v52 = vcombine.low %v994_v47, %v1002_v49  ;;  %v1020_v60 = vcombine.high %v994_v47, %v1002_v49  ;;  %v719_v22 = vrot.slane %v711_v18, %v2632_v42 }
 0x1bf   : > { %v1035_v53 = vcombine.low %v1010_v50, %v1018_v51  ;;  %v1036_v61 = vcombine.high %v1010_v50, %v1018_v51  ;;  %v726_v23 = vrot.slane %v712_v19, %v2632_v42 }
 0x1c0   : > { %v1027_v54 = vrot.slane %v1019_v52, %v2634_v48  ;;  %v1034_v5 = vrot.slane %v1020_v60, %v2634_v48  ;;  %v727_v24 = vcombine.low %v703_v20, %v719_v22  ;;  %v728_v25 = vcombine.high %v703_v20, %v719_v22 }
 0x1c1   : > { %v1043_v55 = vrot.slane %v1035_v53, %v2634_v48  ;;  %v1050_v6 = vrot.slane %v1036_v61, %v2634_v48  ;;  %v743_v26 = vcombine.low %v710_v21, %v726_v23  ;;  %v744_v27 = vcombine.high %v710_v21, %v726_v23 }
 0x1c2   : > { %v1060_v56 = vld [vmem:[#allocation2] sm:$0xf]  ;;  %v1061_v57 = vld [vmem:[#allocation2 + $0x4] sm:$0xf]  ;;  %v735_v29 = vrot.slane %v727_v24, %v2634_v48  ;;  %v742_v30 = vrot.slane %v728_v25, %v2634_v48 }
 0x1c3   : > { %v1075_v58 = vsel %vm1070_vm3, %v1060_v56, 0  ;;  %v1121_v59 = vsel %vm1070_vm3, %v1061_v57, 0  ;;  %v1051_v62 = vcombine.low %v1027_v54, %v1043_v55  ;;  %v1052_v63 = vcombine.high %v1027_v54, %v1043_v55  ;;  %v1062_v1 = vld [vmem:[#allocation2 + $0x8] sm:$0xf]  ;;  %v1063_v2 = vld [vmem:[#allocation2 + $0xc] sm:$0xf] }
 0x1c4   : > { %1982 = vmatpush3.bf16.xpose.msra.mxu1 %v1075_v58  ;;  %1988 = vmatpush3.bf16.xpose.msra.mxu0 %v1121_v59  ;;  %v1167_v7 = vsel %vm1070_vm3, %v1062_v1, 0  ;;  %v1213_v8 = vsel %vm1070_vm3, %v1063_v2, 0  ;;  %v1053_v9 = vcombine.low %v1034_v5, %v1050_v6  ;;  %v1054_v10 = vcombine.high %v1034_v5, %v1050_v6 }
 0x1c5   : > { %1993 = vmatprep.subr.bf16.mxu1 %v2362_v0  ;;  %1999 = vmatprep.subr.bf16.mxu0 %v2362_v0  ;;  %v1055_v3 = vpack.c.bf16 %v1051_v62, %v1051_v62  ;;  %v1056_v4 = vpack.c.bf16 %v1052_v63, %v1052_v63  ;;  %v751_v28 = vrot.slane %v743_v26, %v2634_v48  ;;  %v1909_v62 = vld [vmem:[%s383_s7] ss:$0 sm:$0xff] }
 0x1c6   : > { %v1057_v11 = vpack.c.bf16 %v1053_v9, %v1053_v9  ;;  %v1058_v12 = vpack.c.bf16 %v1054_v10, %v1054_v10  ;;  %v758_v31 = vrot.slane %v744_v27, %v2634_v48  ;;  %v763_v32 = vcombine.low %v735_v29, %v742_v30 }
 0x1c7   : > { %v1901_v33 = vcombine.high %v735_v29, %v742_v30 }
 0x1c8   : > { %v779_v34 = vcombine.low %v751_v28, %v758_v31  ;;  %v1902_v35 = vcombine.high %v751_v28, %v758_v31  ;;  %v770_v36 = vrot.slane %v763_v32, %v2632_v42 }
 0x1c9   : > { %v778_v37 = vrot.slane %v1901_v33, %v2632_v42 }
 0x1ca   : > { %v786_v38 = vrot.slane %v779_v34, %v2632_v42  ;;  %v794_v39 = vrot.slane %v1902_v35, %v2632_v42 }
 0x1cb   : > { %1984 = vmatmul.mubr.msk.bf16.vlgmr.msra.gmra.mxu1 %vm1070_vm3, %v1055_v3  ;;  %1990 = vmatmul.mubr.msk.bf16.vlgmr.msra.gmra.mxu0 %vm1070_vm3, %v1056_v4  ;;  %v795_v40 = vcombine.low %v770_v36, %v778_v37  ;;  %v796_v41 = vcombine.high %v770_v36, %v778_v37 }
 0x1cc   : > { %1994 = vmatpush3.bf16.xpose.msra.mxu1 %v1167_v7  ;;  %2000 = vmatpush3.bf16.xpose.msra.mxu0 %v1213_v8  ;;  %v811_v43 = vcombine.low %v786_v38, %v794_v39  ;;  %v812_v44 = vcombine.high %v786_v38, %v794_v39 }
 0x1cd   : > { %1995 = vmatprep.mubr.msk.bf16.mxu1 %vm2363_vm0, %v2362_v0  ;;  %2001 = vmatprep.mubr.msk.bf16.mxu0 %vm2363_vm0, %v2362_v0  ;;  %v803_v45 = vrot.slane %v795_v40, %v2634_v48  ;;  %v810_v46 = vrot.slane %v796_v41, %v2634_v48 }
 0x1ce   : > { %2005 = vmatprep.subr.bf16.mxu1 %v2362_v0  ;;  %2011 = vmatprep.subr.bf16.mxu0 %v2362_v0  ;;  %v819_v47 = vrot.slane %v811_v43, %v2634_v48  ;;  %v826_v49 = vrot.slane %v812_v44, %v2634_v48 }
 0x1d0   : > { %v827_v50 = vcombine.low %v803_v45, %v819_v47  ;;  %v828_v51 = vcombine.high %v803_v45, %v819_v47  ;;  %v829_v52 = vcombine.low %v810_v46, %v826_v49  ;;  %v830_v53 = vcombine.high %v810_v46, %v826_v49 }
 0x1d2   : > { %v831_v54 = vpack.c.bf16 %v827_v50, %v827_v50  ;;  %v832_v55 = vpack.c.bf16 %v828_v51, %v828_v51  ;;  %v833_v56 = vpack.c.bf16 %v829_v52, %v829_v52  ;;  %v834_v57 = vpack.c.bf16 %v830_v53, %v830_v53 }
 0x1d3   : > { %1996 = vmatmul.mubr.msk.bf16.vlgmr.msra.gmra.mxu1 %vm1070_vm3, %v1057_v11  ;;  %2002 = vmatmul.mubr.msk.bf16.vlgmr.msra.gmra.mxu0 %vm1070_vm3, %v1058_v12 }
 0x1d4   : > { %2007 = vmatprep.mubr.msk.bf16.mxu1 %vm2363_vm0, %v2362_v0  ;;  %2013 = vmatprep.mubr.msk.bf16.mxu0 %vm2363_vm0, %v2362_v0  ;;  %835 = vst.msk [vmem:[#allocation3] sm:$0xf] %vm680_vm2, %v831_v54  ;;  %836 = vst.msk [vmem:[#allocation3 + $0x4] sm:$0xf] %vm680_vm2, %v832_v55 }
 0x1d5   : > { %837 = vst.msk [vmem:[#allocation3 + $0x8] sm:$0xf] %vm680_vm2, %v833_v56  ;;  %838 = vst.msk [vmem:[#allocation3 + $0xc] sm:$0xf] %vm680_vm2, %v834_v57 }
 0x1db   : > { %v1295_v58 = vld [vmem:[#allocation3] sm:$0xf]  ;;  %v1296_v59 = vld [vmem:[#allocation3 + $0x4] sm:$0xf] }
 0x1dc   : > { %v1304_v60 = vsel %vm1302_vm4, %v1295_v58, 0  ;;  %v1350_v61 = vsel %vm1302_vm4, %v1296_v59, 0  ;;  %v1297_v37 = vld [vmem:[#allocation3 + $0x8] sm:$0xf]  ;;  %v1298_v41 = vld [vmem:[#allocation3 + $0xc] sm:$0xf] }
 0x1dd   : > { %2006 = vmatpush3.bf16.msra.mxu1 %v1304_v60  ;;  %2012 = vmatpush3.bf16.msra.mxu0 %v1350_v61  ;;  %v1396_v45 = vsel %vm1302_vm4, %v1297_v37, 0  ;;  %v1442_v46 = vsel %vm1302_vm4, %v1298_v41, 0 }
 0x1de   : > { %2017 = vmatprep.subr.bf16.mxu1 %v2362_v0  ;;  %2023 = vmatprep.subr.bf16.mxu0 %v2362_v0 }
 0x28b   : > { %v1111_v63 = vpop.f32.mrf.mxu1  ;;  %v1157_v1 = vpop.f32.mrf.mxu0 }
 0x28c   : > { %v1112_v2 = vadd.f32 %v1909_v62, %v1111_v63  ;;  %v1158_v3 = vadd.f32 %v1909_v62, %v1157_v1 }
 0x28d   : > { %v1985_v4 = vpop.f32.mrf.mxu1  ;;  %v1991_v5 = vpop.f32.mrf.mxu0 }
 0x28e   : > { %v1255_v6 = vsel %vm1070_vm3, %v1112_v2, -inf  ;;  %v1258_v7 = vsel %vm1070_vm3, %v1158_v3, -inf }
 0x28f   : > { %1256 = vmax.xlane.f32.xlu1 %v1255_v6  ;;  %v1114_v8 = vpop.f32.mrf.mxu1  ;;  %1259 = vmax.xlane.f32.xlu0 %v1258_v7  ;;  %v1160_v9 = vpop.f32.mrf.mxu0 }
 0x291   : > { %v1986_v10 = vpop.f32.mrf.mxu1  ;;  %v1992_v11 = vpop.f32.mrf.mxu0 }
 0x293   : > { %v1203_v12 = vpop.f32.mrf.mxu1  ;;  %v1249_v13 = vpop.f32.mrf.mxu0 }
 0x294   : > { %v1204_v14 = vadd.f32 %v1909_v62, %v1203_v12  ;;  %v1250_v15 = vadd.f32 %v1909_v62, %v1249_v13 }
 0x295   : > { %v1997_v16 = vpop.f32.mrf.mxu1  ;;  %v2003_v17 = vpop.f32.mrf.mxu0 }
 0x296   : > { %v1261_v18 = vsel %vm1070_vm3, %v1204_v14, -inf  ;;  %v1264_v19 = vsel %vm1070_vm3, %v1250_v15, -inf }
 0x297   : > { %v1206_v20 = vpop.f32.mrf.mxu1  ;;  %1262 = vmax.xlane.f32.xlu0 %v1261_v18  ;;  %1265 = vmax.xlane.f32.xlu1 %v1264_v19  ;;  %v1252_v21 = vpop.f32.mrf.mxu0 }
 0x299   : > { %v1998_v22 = vpop.f32.mrf.mxu1  ;;  %v2004_v23 = vpop.f32.mrf.mxu0 }
 0x318   : > { %v1257_v24 = vpop.xlane.xlu1 %1256  ;;  %v1260_v25 = vpop.xlane.xlu0 %1259 }
 0x319   : > { %v1267_v26 = vsub.f32 %v1112_v2, %v1257_v24  ;;  %v1268_v27 = vsub.f32 %v1158_v3, %v1260_v25 }
 0x31b   : > { %v1271_v29 = vmul.f32 1.442695, %v1267_v26  ;;  %v1273_v30 = vmul.f32 1.442695, %v1268_v27 }
 0x31d   : > { %2140 = vpow2.f32 %v1271_v29 }
 0x31e   : > { %2142 = vpow2.f32 %v1273_v30 }
 0x320   : > { %v1263_v28 = vpop.xlane.xlu0 %1262  ;;  %v1266_v31 = vpop.xlane.xlu1 %1265 }
 0x321   : > { %v1269_v32 = vsub.f32 %v1204_v14, %v1263_v28  ;;  %v1270_v33 = vsub.f32 %v1250_v15, %v1266_v31  ;;  %v2138_v31 = vld [vmem:[#allocation10 + $0x38] sm:$0xff]  }
 0x323   : > { %v1275_v34 = vmul.f32 1.442695, %v1269_v32  ;;  %v1277_v35 = vmul.f32 1.442695, %v1270_v33 }
 0x325   : > { %2144 = vpow2.f32 %v1275_v34 }
 0x326   : > { %2146 = vpow2.f32 %v1277_v35 }
 0x32a   : > { %v2141_v36 = vpop.eup %2140 }
 0x32b   : > { %v2143_v38 = vpop.eup %2142  ;;  %v1279_v39 = vsel %vm1070_vm3, %v2141_v36, 0.0  ;;  %v1291_v40 = vpack.c.bf16 %v2141_v36, %v2141_v36 }
 0x32c   : > { %1280 = vadd.xlane.f32.xlu0 %v1279_v39  ;;  %v1282_v43 = vsel %vm1070_vm3, %v2143_v38, 0.0  ;;  %v1292_v44 = vpack.c.bf16 %v2143_v38, %v2143_v38 }
 0x32d   : > { %1283 = vadd.xlane.f32.xlu1 %v1282_v43  ;;  %2008 = vmatmul.mubr.msk.bf16.vlgmr.msra.gmra.mxu1 %vm1070_vm3, %v1291_v40  ;;  %v2139_v40 = vld [vmem:[#allocation10 + $0x30] sm:$0xff]  }
 0x32e   : > { %2014 = vmatmul.mubr.msk.bf16.vlgmr.msra.gmra.mxu0 %vm1070_vm3, %v1292_v44  ;;  %2018 = vmatpush3.bf16.msra.mxu1 %v1396_v45 }
 0x32f   : > { %2024 = vmatpush3.bf16.msra.mxu0 %v1442_v46  ;;  %2019 = vmatprep.mubr.msk.bf16.mxu1 %vm2363_vm0, %v2362_v0 }
 0x330   : > { %2025 = vmatprep.mubr.msk.bf16.mxu0 %vm2363_vm0, %v2362_v0  ;;  %2029 = vmatprep.subr.bf16.mxu1 %v2362_v0 }
 0x332   : > { %v2145_v47 = vpop.eup %2144 }
 0x333   : > { %v2147_v49 = vpop.eup %2146  ;;  %v1285_v50 = vsel %vm1070_vm3, %v2145_v47, 0.0  ;;  %v1293_v51 = vpack.c.bf16 %v2145_v47, %v2145_v47 }
 0x334   : > { %1286 = vadd.xlane.f32.xlu0 %v1285_v50  ;;  %v1288_v52 = vsel %vm1070_vm3, %v2147_v49, 0.0  ;;  %v1294_v53 = vpack.c.bf16 %v2147_v49, %v2147_v49 }
 0x335   : > { %1289 = vadd.xlane.f32.xlu1 %v1288_v52  ;;  %2020 = vmatmul.mubr.msk.bf16.vlgmr.msra.gmra.mxu1 %vm1070_vm3, %v1293_v51 }
 0x336   : > { %2026 = vmatmul.mubr.msk.bf16.vlgmr.msra.gmra.mxu0 %vm1070_vm3, %v1294_v53  ;;  %2033 = vmatprep.mubr.msk.bf16.mxu1 %vm2363_vm0, %v2362_v0 }
 0x337   : > { %2030 = vmatpush3.bf16.msra.mxu1 %v2138_v31 }
 0x338   : > { %2031 = vmatprep.subr.bf16.mxu1 %v2362_v0 }
 0x33b   : > { %2032 = vmatpush3.bf16.msra.mxu1 %v2139_v40 }
 0x3b5   : > { %v1281_v54 = vpop.xlane.xlu0 %1280 }
 0x3b6   : > { %v1284_v55 = vpop.xlane.xlu1 %1283  ;;  %2148 = vrcp.f32 %v1281_v54 }
 0x3b7   : > { %2150 = vrcp.f32 %v1284_v55 }
 0x3bd   : > { %v1287_v56 = vpop.xlane.xlu0 %1286 }
 0x3be   : > { %v1290_v57 = vpop.xlane.xlu1 %1289  ;;  %2152 = vrcp.f32 %v1287_v56 }
 0x3bf   : > { %2154 = vrcp.f32 %v1290_v57 }
 0x3c3   : > { %v2149_v1 = vpop.eup %2148 }
 0x3c4   : > { %v2151_v3 = vpop.eup %2150 }
 0x3cb   : > { %v2153_v5 = vpop.eup %2152 }
 0x3cc   : > { %v2155_v7 = vpop.eup %2154 }
 0x3ed   : > { %v1340_v58 = vpop.f32.mrf.mxu1 }
 0x3ee   : > { %v1386_v59 = vpop.f32.mrf.mxu0  ;;  %v1488_v8 = vmul.f32 %v2149_v1, %v1340_v58 }
 0x3ef   : > { %v2009_v60 = vpop.f32.mrf.mxu1  ;;  %v1489_v11 = vmul.f32 %v2151_v3, %v1386_v59 }
 0x3f0   : > { %v2015_v61 = vpop.f32.mrf.mxu0 }
 0x3f1   : > { %v1343_v62 = vpop.f32.mrf.mxu1 }
 0x3f2   : > { %v1389_v63 = vpop.f32.mrf.mxu0 }
 0x3f3   : > { %v2010_v2 = vpop.f32.mrf.mxu1  ;;  %v1921_v63 = vld [vmem:[%s2827_s5 + $0x3] ss:$0 sm:$0xff] }
 0x3f4   : > { %v2016_v4 = vpop.f32.mrf.mxu0 }
 0x3f5   : > { %v1432_v6 = vpop.f32.mrf.mxu1 }
 0x3f6   : > { %v1490_v9 = vmul.f32 %v2153_v5, %v1432_v6  ;;  %v1478_v10 = vpop.f32.mrf.mxu0 }
 0x3f7   : > { %v1491_v12 = vmul.f32 %v2155_v7, %v1478_v10  ;;  %v2021_v13 = vpop.f32.mrf.mxu1 }
 0x3f8   : > { %v1492_v14 = vcombine.low %v1488_v8, %v1490_v9  ;;  %v1493_v15 = vcombine.high %v1488_v8, %v1490_v9  ;;  %v2027_v16 = vpop.f32.mrf.mxu0 }
 0x3f9   : > { %v1508_v17 = vcombine.low %v1489_v11, %v1491_v12  ;;  %v1509_v18 = vcombine.high %v1489_v11, %v1491_v12  ;;  %v1435_v19 = vpop.f32.mrf.mxu1 }
 0x3fa   : > { %v1500_v20 = vrot.slane %v1492_v14, %v2632_v42  ;;  %v1507_v21 = vrot.slane %v1493_v15, %v2632_v42  ;;  %v1481_v22 = vpop.f32.mrf.mxu0 }
 0x3fb   : > { %v1516_v23 = vrot.slane %v1508_v17, %v2632_v42  ;;  %v1523_v24 = vrot.slane %v1509_v18, %v2632_v42  ;;  %v2022_v25 = vpop.f32.mrf.mxu1 }
 0x3fc   : > { %v2028_v26 = vpop.f32.mrf.mxu0 }
 0x3fd   : > { %v1524_v27 = vcombine.low %v1500_v20, %v1516_v23  ;;  %v1525_v29 = vcombine.high %v1500_v20, %v1516_v23  ;;  %v1540_v30 = vcombine.low %v1507_v21, %v1523_v24  ;;  %v1541_v28 = vcombine.high %v1507_v21, %v1523_v24 }
 0x3ff   : > { %v1532_v32 = vrot.slane %v1524_v27, %v2634_v48  ;;  %v1539_v33 = vrot.slane %v1525_v29, %v2634_v48  ;;  %v1548_v34 = vrot.slane %v1540_v30, %v2634_v48  ;;  %v1555_v35 = vrot.slane %v1541_v28, %v2634_v48 }
 0x401   : > { %v1560_v36 = vcombine.low %v1532_v32, %v1539_v33  ;;  %v1918_v37 = vcombine.high %v1532_v32, %v1539_v33  ;;  %v1576_v38 = vcombine.low %v1548_v34, %v1555_v35  ;;  %v1919_v39 = vcombine.high %v1548_v34, %v1555_v35 }
 0x403   : > { %v1567_v41 = vrot.slane %v1560_v36, %v2632_v42  ;;  %v1575_v43 = vrot.slane %v1918_v37, %v2632_v42  ;;  %v1583_v44 = vrot.slane %v1576_v38, %v2632_v42  ;;  %v1591_v45 = vrot.slane %v1919_v39, %v2632_v42 }
 0x405   : > { %v1593_v46 = vcombine.high %v1567_v41, %v1575_v43  ;;  %v1609_v47 = vcombine.high %v1583_v44, %v1591_v45  ;;  %v1592_v49 = vcombine.low %v1567_v41, %v1575_v43  ;;  %v1608_v50 = vcombine.low %v1583_v44, %v1591_v45 }
 0x407   : > { %v1607_v0 = vrot.slane %v1593_v46, %v2634_v48  ;;  %v1623_v51 = vrot.slane %v1609_v47, %v2634_v48  ;;  %v1600_v52 = vrot.slane %v1592_v49, %v2634_v48  ;;  %v1616_v53 = vrot.slane %v1608_v50, %v2634_v48 }
 0x409   : > { %v1626_v54 = vcombine.low %v1607_v0, %v1623_v51  ;;  %v1625_v55 = vcombine.high %v1600_v52, %v1616_v53  ;;  %v1624_v56 = vcombine.low %v1600_v52, %v1616_v53  ;;  %v1627_v42 = vcombine.high %v1607_v0, %v1623_v51 }
 0x40b   : > { %1633 = vrot.lane.b32.xlu1 %v1626_v54, %s2369_s8  ;;  %1629 = vrot.lane.b32.xlu0 %v1625_v55, %s2370_s9 }
 0x40f   : > { %1637 = vrot.lane.b32.xlu1 %v1627_v42, %s2371_s17 }
 0x47d   : > { %v1634_v57 = vpop.permute.xlu1 %1633  ;;  %v1630_v58 = vpop.permute.xlu0 %1629 }
 0x47e   : > { %v1640_v59 = vsel %vm1070_vm3, %v1624_v56, %v1630_v58 }
 0x47f   : > { %v1642_v48 = vsel %vm1641_vm5, %v1640_v59, %v1634_v57 }
 0x481   : > { %v1638_v60 = vpop.permute.xlu1 %1637 }
 0x482   : > { %v1644_v61 = vsel %vm1643_vm6, %v1642_v48, %v1638_v60 }
 0x483   : > { %v1645_v62 = vpack.c.bf16 %v1644_v61, %v1644_v61 }
 0x485   : > { %2034 = vmatmul.mubr.msk.bf16.vlgmr.msra.gmra.mxu1 %vm418_vm1, %v1645_v62 }
 0x545   : > { %v1708_v1 = vpop.f32.mrf.mxu1 }
 0x546   : > { %v1709_v2 = vadd.f32 %v1921_v63, %v1708_v1 }
 0x547   : > { %v2035_v3 = vpop.f32.mrf.mxu1 }
 0x548   : > { %1714 = vst.msk [vmem:[%s380_s12] sm:$0xff] %vm418_vm1, %v1709_v2 }
 0x549   : > { %v1711_v4 = vpop.f32.mrf.mxu1 }
 0x54a   : > { %2279 = shalt.err (!%p2276_p9)
}
 0x54b   : > { %s2280_s28 = scalar_lea.hbm %s2773_s26, 128  ;;  %s2284_s27 = scalar_lea.hbm %s2828_s6, 256 }
 0x54c   : > { %p2281_p10 = scmp.ne.s32.totalorder %s2773_s26, %s2280_s28  ;;  %p2285_p2 = scmp.lt.s32.totalorder %s2773_s26, %s2828_s6 }
 0x54d   : > { %p2286_p11 = scmp.lt.s32.totalorder %s2284_s27, %s2280_s28 }
 0x54e   : > { %p2282_p0 = pnand %p2281_p10, %p2501_p12 }
 0x54f   : > { %p2287_p3 = por %p2286_p11, %p2285_p2 }
 0x550   : > { %p2283_p7 = pneg %p2282_p0 }
 0x552   : > { %p2288_p1 = pnand %p2287_p3, %p2283_p7 }
 0x554   : > { %2291 = shalt.err (!%p2288_p1)
}
 0x555   : > { %2047 = dma.vmem_to_hbm [thread:$0]  (%p2501_p12), %s2775_s19, 128, %s2773_s26, %s1716_s10   ;;  %v2036_v5 = vpop.f32.mrf.mxu1 }
 0x556 PF: > { %s2857_s17 = sld [smem:[#allocation18_spill]]  ;;  %s1742_s15 = sand.u32 1, %s2334_s21  }
 0x557   : > { %s1743_s18 = scalar_lea.sflag [#allocation6], %s1742_s15 }
 0x55c   : > { %p2858_p4 = scmp.ge.s32.totalorder %s2857_s17, 2 }
 0x55e   : > { %p2064_p5 = pnand %p2858_p4, %p2505_p13 }
 0x560   : > { %p2065_p8 = pneg %p2064_p5 }
 0x562   : > { %2329 = dma.done.wait (%p2065_p8), %s1743_s18, 128  }
 0x563   : > { %2331 = vsyncadd (%p2065_p8), %s1743_s18, 4294967168  ;;  %s26_s26 = sadd.s32 1, %s2857_s17   ;;  %s2859_s13 = sld [smem:[#allocation20_spill]] }
 0x564   : > { %p23_p6 = scmp.ge.s32.totalorder %s26_s26, 4   ;;  %s2860_s24 = sld [smem:[#allocation17_spill]] }
 0x565   : > { %s2861_s25 = sld [smem:[#allocation19_spill]]  ;;  %s2862_s21 = smov %s2338_s22 }
 0x566   : > { %s2863_s22 = smov %s2342_s23  ;;  %25 = sbr.rel (!%p23_p6) target bundleno = 11 (0xb), region = 130 }
 0x569   : > { %s2864_s23 = smov %s2859_s13 }
 0x56b   :  { %1748 = vsyncpa [#allocation5], 1 }
 0x56c   :  { %1750 = vsyncpa [#allocation5 + $0x1], 1 }
 0x56d   :  { %1751 = vsyncpa [#allocation8], 1 }
 0x56e   :  { %1753 = vsyncpa [#allocation8 + $0x1], 1 }
 0x56f   :  { %1754 = vsyncpa [#allocation11], 1 }
 0x570   :  { %1755 = vsyncpa [#allocation6], 1 }
 0x571   :  { %1757 = vsyncpa [#allocation6 + $0x1], 1 }

</bundles_post_ra>
